<compile_context>
chip_gen: v7x
topology: tpu7x:2x2x1
jax: 0.10.0
libtpu: 0.0.40
codegen_flags: <defaults>
</compile_context>

<pallas_src>
import functools

import jax
import jax.numpy as jnp
from jax import lax
from jax.experimental import pallas as pl
from jax.experimental.pallas import tpu as pltpu

EPS = 1e-5  # PyTorch BatchNorm default eps


# ----------------------------------------------------------------------------
# Fused Pallas kernel (B_tile batch elements per grid step)
# ----------------------------------------------------------------------------
def vgg_block_bam_kernel(
        x_ref,                                   # (B, H, W*Cin)                    f32
        wtc_ref, scale_ref, shift_ref,           # (3,(W+2)*Cin,W*C) bf16, (1,W*C)x2
        w1t_ref, s1_ref, sh1_ref,                # (W*C,Cr) f32, (1,Cr), (1,Cr)
        w2t_ref, b2t_ref,                        # (Cr,W*C) f32, (1,W*C)
        wrbd_ref, srt_ref, shrt_ref,             # (W*C,W*Cr) bf16, (1,W*Cr)x2
        wd0_ref, sd0_ref, shd0_ref,              # (3,(W+8)*Cr,W*Cr) bf16, (1,W*Cr)x2
        wd1_ref, sd1_ref, shd1_ref,              # (3,(W+8)*Cr,W*Cr) bf16, (1,W*Cr)x2
        wfx_ref, bf_ref,                         # (W*Cr,W*C) bf16, (1,1)
        o_ref,                                   # (B, H, W*C)                      f32
        xpad_ref, spad_ref, feat_ref,            # VMEM scratch
        *, B, H, W, Cin, C, Cr):
    f32 = jnp.float32
    bf16 = jnp.bfloat16
    WC, WCin, WCr = W * C, W * Cin, W * Cr

    # ---- stage padded input: halo-only zeroing + interior fill (lane-dense rows) ----
    zrow_x = jnp.zeros((1, (W + 2) * Cin), f32)
    zcol_x = jnp.zeros((H, Cin), f32)
    for b in range(B):
        xpad_ref[b, 0:1, :] = zrow_x
        xpad_ref[b, H + 1:H + 2, :] = zrow_x
        xpad_ref[b, 1:H + 1, 0:Cin] = zcol_x
        xpad_ref[b, 1:H + 1, (W + 1) * Cin:(W + 2) * Cin] = zcol_x
        xpad_ref[b, 1:H + 1, Cin:Cin + WCin] = x_ref[b]

    # ---- conv3x3 (pad=1) + BN + ReLU : 3 block-Toeplitz MXU dots, lane-dense output ----
    acc = jnp.zeros((B * H, WC), f32)
    for kh in range(3):
        a = jnp.concatenate([xpad_ref[b, kh:kh + H, :] for b in range(B)], axis=0)
        acc = acc + jnp.dot(a.astype(bf16), wtc_ref[kh], preferred_element_type=f32)
    # Park feat in VMEM (freed registers; re-read by both gates and the final combine).
    feat_ref[...] = jnp.maximum(acc * scale_ref[...] + shift_ref[...], 0.0)   # (B*H, W*C)

    # ---- channel gate: avg-pool + Linear folded into one W-tiled dot -> BN1d -> ReLU -> Linear
    cols = jnp.concatenate(
        [jnp.sum(feat_ref[b * H:(b + 1) * H, :], axis=0, keepdims=True) for b in range(B)],
        axis=0)                                                                # (B, W*C)
    h = jnp.dot(cols, w1t_ref[...], preferred_element_type=f32)               # (B, Cr)
    h = jnp.maximum(h * s1_ref[...] + sh1_ref[...], 0.0)
    ch_t = jnp.dot(h, w2t_ref[...], preferred_element_type=f32) + b2t_ref[...]  # (B, W*C)

    # ---- spatial gate: 1x1 reduce as a block-diagonal dot (stays lane-dense) ----
    s = jnp.dot(feat_ref[...].astype(bf16), wrbd_ref[...], preferred_element_type=f32)
    s = jnp.maximum(s * srt_ref[...] + shrt_ref[...], 0.0)                    # (B*H, W*Cr)

    # Zero the dilated-conv halo strips once per step (interior fully overwritten below).
    zrow_s = jnp.zeros((4, (W + 8) * Cr), f32)
    zcol_s = jnp.zeros((H, 4 * Cr), f32)
    for b in range(B):
        spad_ref[b, 0:4, :] = zrow_s
        spad_ref[b, H + 4:H + 8, :] = zrow_s
        spad_ref[b, 4:H + 4, 0:4 * Cr] = zcol_s
        spad_ref[b, 4:H + 4, (W + 4) * Cr:(W + 8) * Cr] = zcol_s

    def dilated(s_in, wd_ref, sd_ref, shd_ref):
        # 3x3, dilation=4, padding=4 : 3 block-Toeplitz dots (one per kh).
        for b in range(B):
            spad_ref[b, 4:H + 4, 4 * Cr:4 * Cr + WCr] = s_in[b * H:(b + 1) * H, :]
        y = jnp.zeros((B * H, WCr), f32)
        for kh in range(3):
            a = jnp.concatenate([spad_ref[b, kh * 4:kh * 4 + H, :] for b in range(B)],
                                axis=0)
            y = y + jnp.dot(a.astype(bf16), wd_ref[kh], preferred_element_type=f32)
        return jnp.maximum(y * sd_ref[...] + shd_ref[...], 0.0)               # (B*H, W*Cr)

    s = dilated(s, wd0_ref, sd0_ref, shd0_ref)
    s = dilated(s, wd1_ref, sd1_ref, shd1_ref)

    # Final 1x1 (Cr -> 1) fused with the broadcast over the C lanes of each pixel:
    # no 1-lane outputs, no separate expand.
    sp = jnp.dot(s.astype(bf16), wfx_ref[...], preferred_element_type=f32) + bf_ref[...]

    # ---- BAM combine: out = (1 + sigmoid(channel_att * spatial_att)) * feat ----------
    for b in range(B):
        prod = ch_t[b:b + 1, :] * sp[b * H:(b + 1) * H, :]                    # (H, W*C)
        att = 1.0 + 1.0 / (1.0 + jnp.exp(-prod))                              # exact sigmoid
        o_ref[b, :, :] = (att * feat_ref[b * H:(b + 1) * H, :]).astype(o_ref.dtype)


# ----------------------------------------------------------------------------
# Wrapper
# ----------------------------------------------------------------------------
def _fold_bn(bn, pre_bias):
    # BatchNorm eval fold: scale*(x + pre_bias - mean) + beta  ==  x*scale + shift
    scale = bn['gamma'] / jnp.sqrt(bn['var'] + EPS)
    shift = bn['beta'] + scale * (pre_bias - bn['mean'])
    return scale[None, :].astype(jnp.float32), shift[None, :].astype(jnp.float32)


def _toeplitz_kh(w_hwio, W, Wp, dil):
    # (3,3,Ci,Co) -> (3, Wp*Ci, W*Co): per-kh block-Toeplitz so that
    # (H, Wp*Ci) @ T_kh == conv row contribution in the lane-dense (H, W*Co) layout.
    KH, KW, Ci, Co = w_hwio.shape
    ws = jnp.arange(W)
    slabs = []
    for kh in range(KH):
        T = jnp.zeros((Wp, Ci, W, Co), jnp.float32)
        for kw in range(KW):
            T = T.at[ws + kw * dil, :, ws, :].add(w_hwio[kh, kw].astype(jnp.float32))
        slabs.append(T.reshape(Wp * Ci, W * Co))
    return jnp.stack(slabs, axis=0)


def vgg_block_forward(x_nchw, p, b_tile=None):
    N, Cin, H, W = x_nchw.shape
    C = p['conv_w'].shape[-1]
    Cr = p['cg_fc0_w'].shape[-1]
    WC, WCin, WCr = W * C, W * Cin, W * Cr

    if b_tile is None:
        # Stack images into the matmul M dim, but keep >=2 grid steps for the v7x 2-TC split.
        b_tile = 2 if (N % 2 == 0 and N >= 4) else 1
    assert N % b_tile == 0

    # NCHW -> lane-dense (N, H, W*Cin) input slab (dense-ish HBM->VMEM DMA).
    x = jnp.transpose(x_nchw, (0, 2, 3, 1)).astype(jnp.float32).reshape(N, H, WCin)

    # Fold all BatchNorms (eval mode) into per-channel scale/shift, tiled over the W lanes.
    scale, shift = _fold_bn(p['bn'], p['conv_b'])
    s1, sh1 = _fold_bn(p['cg_bn'], p['cg_fc0_b'])
    sr, shr = _fold_bn(p['sg_red_bn'], p['sg_red_b'])
    sd0, shd0 = _fold_bn(p['sg_d0_bn'], p['sg_d0_b'])
    sd1, shd1 = _fold_bn(p['sg_d1_bn'], p['sg_d1_b'])
    tile_w = lambda v: jnp.tile(v, (1, W))

    # Block-Toeplitz conv weights (bf16 MXU operands).
    wtc = _toeplitz_kh(p['conv_w'], W, W + 2, 1).astype(jnp.bfloat16)
    wd0 = _toeplitz_kh(p['sg_d0_w'], W, W + 8, 4).astype(jnp.bfloat16)
    wd1 = _toeplitz_kh(p['sg_d1_w'], W, W + 8, 4).astype(jnp.bfloat16)

    # Channel gate: avg-pool folded into a W-tiled fc0 weight; fc1 tiled to W*C lanes.
    w1t = jnp.tile(p['cg_fc0_w'].astype(jnp.float32), (W, 1)) / float(H * W)   # (W*C, Cr)
    w2t = jnp.tile(p['cg_fc1_w'].astype(jnp.float32), (1, W))                  # (Cr, W*C)
    b2t = jnp.tile(p['cg_fc1_b'].astype(jnp.float32), W)[None, :]              # (1, W*C)

    # Spatial gate 1x1s as block-diagonal / block-broadcast matrices (lane-dense I/O).
    eyeW = jnp.eye(W, dtype=jnp.float32)
    wrbd = jnp.einsum('wv,cr->wcvr', eyeW, p['sg_red_w'].astype(jnp.float32)
                      ).reshape(WC, WCr).astype(jnp.bfloat16)
    wfx = jnp.einsum('wv,r,c->wrvc', eyeW, p['sg_fin_w'][:, 0].astype(jnp.float32),
                     jnp.ones((C,), jnp.float32)).reshape(WCr, WC).astype(jnp.bfloat16)
    bf = p['sg_fin_b'].reshape(1, 1).astype(jnp.float32)

    params = [
        wtc, tile_w(scale), tile_w(shift),
        w1t, s1, sh1, w2t, b2t,
        wrbd, tile_w(sr), tile_w(shr),
        wd0, tile_w(sd0), tile_w(shd0),
        wd1, tile_w(sd1), tile_w(shd1),
        wfx, bf,
    ]

    kernel = functools.partial(vgg_block_bam_kernel,
                               B=b_tile, H=H, W=W, Cin=Cin, C=C, Cr=Cr)

    def full_spec(a):
        nd = a.ndim
        return pl.BlockSpec(a.shape, lambda n, _nd=nd: (0,) * _nd)

    out2d = pl.pallas_call(
        kernel,
        out_shape=jax.ShapeDtypeStruct((N, H, WC), jnp.float32),
        grid=(N // b_tile,),
        in_specs=[pl.BlockSpec((b_tile, H, WCin), lambda n: (n, 0, 0))]
                 + [full_spec(a) for a in params],
        out_specs=pl.BlockSpec((b_tile, H, WC), lambda n: (n, 0, 0)),
        scratch_shapes=[
            pltpu.VMEM((b_tile, H + 2, (W + 2) * Cin), jnp.float32),   # conv pad halo
            pltpu.VMEM((b_tile, H + 8, (W + 8) * Cr), jnp.float32),    # dilated pad halo
            pltpu.VMEM((b_tile * H, WC), jnp.float32),                 # feat parked in VMEM
        ],
        compiler_params=pltpu.CompilerParams(dimension_semantics=("parallel",)),
    )(x, *params)

    # lane-dense (N, H, W*C) slab -> NCHW (layout plumbing in the wrapper, not the kernel)
    return jnp.transpose(out2d.reshape(N, H, W, C), (0, 3, 1, 2))


# ----------------------------------------------------------------------------
# Parameters (deterministic, synthetic)
# ----------------------------------------------------------------------------
def init_params(key, in_channels, channels, reduction=16):
    Cr = channels // reduction
    ks = iter(jax.random.split(key, 40))

    def nrm(shape, scale=0.1):
        return (scale * jax.random.normal(next(ks), shape)).astype(jnp.float32)

    def bn(c):
        return dict(gamma=1.0 + nrm((c,)), beta=nrm((c,)),
                    mean=nrm((c,)), var=1.0 + jnp.abs(nrm((c,))))

    return {
        # VGGBlock conv3x3 + BN
        'conv_w': nrm((3, 3, in_channels, channels)),   # HWIO
        'conv_b': nrm((channels,)),
        'bn': bn(channels),
        # ChannelGate: Linear(C,Cr) -> BN1d -> ReLU -> Linear(Cr,C)
        'cg_fc0_w': nrm((channels, Cr)),
        'cg_fc0_b': nrm((Cr,)),
        'cg_bn': bn(Cr),
        'cg_fc1_w': nrm((Cr, channels)),
        'cg_fc1_b': nrm((channels,)),
        # SpatialGate: 1x1 reduce -> 2x dilated 3x3 (d=4) -> 1x1 -> 1 channel
        'sg_red_w': nrm((channels, Cr)),
        'sg_red_b': nrm((Cr,)),
        'sg_red_bn': bn(Cr),
        'sg_d0_w': nrm((3, 3, Cr, Cr)),
        'sg_d0_b': nrm((Cr,)),
        'sg_d0_bn': bn(Cr),
        'sg_d1_w': nrm((3, 3, Cr, Cr)),
        'sg_d1_b': nrm((Cr,)),
        'sg_d1_bn': bn(Cr),
        'sg_fin_w': nrm((Cr, 1)),
        'sg_fin_b': nrm((1,)),
    }


# ----------------------------------------------------------------------------
# Pure-JAX reference (correctness check)
# ----------------------------------------------------------------------------
def reference_forward(x_nchw, p):
    HP = lax.Precision.HIGHEST
    dn = ('NHWC', 'HWIO', 'NHWC')
    x = jnp.transpose(x_nchw, (0, 2, 3, 1)).astype(jnp.float32)

    def bn_eval(v, bn):
        return (v - bn['mean']) * (bn['gamma'] / jnp.sqrt(bn['var'] + EPS)) + bn['beta']

    y = lax.conv_general_dilated(x, p['conv_w'], (1, 1), ((1, 1), (1, 1)),
                                 dimension_numbers=dn, precision=HP) + p['conv_b']
    feat = jnp.maximum(bn_eval(y, p['bn']), 0.0)

    pooled = feat.mean(axis=(1, 2))
    h = jnp.einsum('nc,cr->nr', pooled, p['cg_fc0_w'], precision=HP) + p['cg_fc0_b']
    h = jnp.maximum(bn_eval(h, p['cg_bn']), 0.0)
    ch = (jnp.einsum('nr,rc->nc', h, p['cg_fc1_w'], precision=HP)
          + p['cg_fc1_b'])[:, None, None, :]

    s = jnp.einsum('nhwc,cr->nhwr', feat, p['sg_red_w'], precision=HP) + p['sg_red_b']
    s = jnp.maximum(bn_eval(s, p['sg_red_bn']), 0.0)
    for wk, bk, bnk in (('sg_d0_w', 'sg_d0_b', 'sg_d0_bn'),
                        ('sg_d1_w', 'sg_d1_b', 'sg_d1_bn')):
        s = lax.conv_general_dilated(s, p[wk], (1, 1), ((4, 4), (4, 4)),
                                     rhs_dilation=(4, 4), dimension_numbers=dn,
                                     precision=HP) + p[bk]
        s = jnp.maximum(bn_eval(s, p[bnk]), 0.0)
    sp = jnp.einsum('nhwr,ro->nhwo', s, p['sg_fin_w'], precision=HP) + p['sg_fin_b']

    att = 1.0 + jax.nn.sigmoid(ch * sp)
    return jnp.transpose(att * feat, (0, 3, 1, 2))


# ----------------------------------------------------------------------------
if __name__ == "__main__":
    key = jax.random.PRNGKey(0)
    kx, kp, kx2 = jax.random.split(key, 3)

    # VGGBlock(in_channels=4, channels=32); x is NCHW like the PyTorch module.
    x = jax.random.normal(kx, (2, 4, 16, 16), dtype=jnp.float32)
    params = init_params(kp, in_channels=4, channels=32)

    out = jax.jit(lambda v: vgg_block_forward(v, params))(x)
    out = jax.block_until_ready(out)

    assert out.shape == (2, 32, 16, 16)
    assert bool(jnp.all(jnp.isfinite(out)))

    ref = reference_forward(x, params)
    assert jnp.allclose(out, ref, atol=3e-2, rtol=3e-2), \
        float(jnp.max(jnp.abs(out - ref)))

    # Also exercise the batched (b_tile=2) matmul-M path.
    x4 = jax.random.normal(kx2, (4, 4, 16, 16), dtype=jnp.float32)
    out4 = jax.block_until_ready(jax.jit(lambda v: vgg_block_forward(v, params))(x4))
    ref4 = reference_forward(x4, params)
    assert out4.shape == (4, 32, 16, 16)
    assert jnp.allclose(out4, ref4, atol=3e-2, rtol=3e-2), \
        float(jnp.max(jnp.abs(out4 - ref4)))

    print("KERNEL_OK")
</pallas_src>

<mosaic_0001>
module attributes {stable_mosaic.version = 11 : i64} {
  func.func @vgg_block_bam_kernel(%arg0: i32, %arg1: memref<1x16x64xf32, #tpu.memory_space<vmem>>, %arg2: memref<3x72x512xbf16, #tpu.memory_space<vmem>>, %arg3: memref<1x512xf32, #tpu.memory_space<vmem>>, %arg4: memref<1x512xf32, #tpu.memory_space<vmem>>, %arg5: memref<512x2xf32, #tpu.memory_space<vmem>>, %arg6: memref<1x2xf32, #tpu.memory_space<vmem>>, %arg7: memref<1x2xf32, #tpu.memory_space<vmem>>, %arg8: memref<2x512xf32, #tpu.memory_space<vmem>>, %arg9: memref<1x512xf32, #tpu.memory_space<vmem>>, %arg10: memref<512x32xbf16, #tpu.memory_space<vmem>>, %arg11: memref<1x32xf32, #tpu.memory_space<vmem>>, %arg12: memref<1x32xf32, #tpu.memory_space<vmem>>, %arg13: memref<3x48x32xbf16, #tpu.memory_space<vmem>>, %arg14: memref<1x32xf32, #tpu.memory_space<vmem>>, %arg15: memref<1x32xf32, #tpu.memory_space<vmem>>, %arg16: memref<3x48x32xbf16, #tpu.memory_space<vmem>>, %arg17: memref<1x32xf32, #tpu.memory_space<vmem>>, %arg18: memref<1x32xf32, #tpu.memory_space<vmem>>, %arg19: memref<32x512xbf16, #tpu.memory_space<vmem>>, %arg20: memref<1x1xf32, #tpu.memory_space<vmem>>, %arg21: memref<1x16x512xf32, #tpu.memory_space<vmem>>, %arg22: memref<1x18x72xf32, #tpu.memory_space<vmem>>, %arg23: memref<1x24x48xf32, #tpu.memory_space<vmem>>, %arg24: memref<16x512xf32, #tpu.memory_space<vmem>>) attributes {dimension_semantics = [#tpu.dimension_semantics<parallel>], iteration_bounds = array<i64: 2>, scalar_prefetch = 0 : i64, scratch_operands = 3 : i64, tpu.core_type = #tpu.core_type<tc>, window_params = [{transform_indices = @transform_0, window_bounds = array<i64: 1, 16, 64>}, {pipeline_mode = #tpu.pipeline_mode<synchronous>, transform_indices = @transform_1, window_bounds = array<i64: 3, 72, 512>}, {pipeline_mode = #tpu.pipeline_mode<synchronous>, transform_indices = @transform_2, window_bounds = array<i64: 1, 512>}, {pipeline_mode = #tpu.pipeline_mode<synchronous>, transform_indices = @transform_3, window_bounds = array<i64: 1, 512>}, {pipeline_mode = #tpu.pipeline_mode<synchronous>, transform_indices = @transform_4, window_bounds = array<i64: 512, 2>}, {pipeline_mode = #tpu.pipeline_mode<synchronous>, transform_indices = @transform_5, window_bounds = array<i64: 1, 2>}, {pipeline_mode = #tpu.pipeline_mode<synchronous>, transform_indices = @transform_6, window_bounds = array<i64: 1, 2>}, {pipeline_mode = #tpu.pipeline_mode<synchronous>, transform_indices = @transform_7, window_bounds = array<i64: 2, 512>}, {pipeline_mode = #tpu.pipeline_mode<synchronous>, transform_indices = @transform_8, window_bounds = array<i64: 1, 512>}, {pipeline_mode = #tpu.pipeline_mode<synchronous>, transform_indices = @transform_9, window_bounds = array<i64: 512, 32>}, {pipeline_mode = #tpu.pipeline_mode<synchronous>, transform_indices = @transform_10, window_bounds = array<i64: 1, 32>}, {pipeline_mode = #tpu.pipeline_mode<synchronous>, transform_indices = @transform_11, window_bounds = array<i64: 1, 32>}, {pipeline_mode = #tpu.pipeline_mode<synchronous>, transform_indices = @transform_12, window_bounds = array<i64: 3, 48, 32>}, {pipeline_mode = #tpu.pipeline_mode<synchronous>, transform_indices = @transform_13, window_bounds = array<i64: 1, 32>}, {pipeline_mode = #tpu.pipeline_mode<synchronous>, transform_indices = @transform_14, window_bounds = array<i64: 1, 32>}, {pipeline_mode = #tpu.pipeline_mode<synchronous>, transform_indices = @transform_15, window_bounds = array<i64: 3, 48, 32>}, {pipeline_mode = #tpu.pipeline_mode<synchronous>, transform_indices = @transform_16, window_bounds = array<i64: 1, 32>}, {pipeline_mode = #tpu.pipeline_mode<synchronous>, transform_indices = @transform_17, window_bounds = array<i64: 1, 32>}, {pipeline_mode = #tpu.pipeline_mode<synchronous>, transform_indices = @transform_18, window_bounds = array<i64: 32, 512>}, {pipeline_mode = #tpu.pipeline_mode<synchronous>, transform_indices = @transform_19, window_bounds = array<i64: 1, 1>}, {transform_indices = @transform_20, window_bounds = array<i64: 1, 16, 512>}]} {
    %cst = arith.constant 0.000000e+00 : f32
    %0 = vector.broadcast %cst : f32 to vector<1x72xf32>
    %cst_0 = arith.constant 0.000000e+00 : f32
    %1 = vector.broadcast %cst_0 : f32 to vector<16x4xf32>
    %c0 = arith.constant 0 : index
    %c0_1 = arith.constant 0 : index
    %c0_2 = arith.constant 0 : index
    %2 = vector.load %arg22[%c0, %c0_1, %c0_2] : memref<1x18x72xf32, #tpu.memory_space<vmem>>, vector<1x1x72xf32>
    %3 = vector.shape_cast %2 : vector<1x1x72xf32> to vector<1x72xf32>
    %4 = vector.shape_cast %0 : vector<1x72xf32> to vector<1x1x72xf32>
    tpu.vector_store %arg22[%c0, %c0_1, %c0_2], %4 {strides = array<i32>} : memref<1x18x72xf32, #tpu.memory_space<vmem>>, vector<1x1x72xf32>,
    %c0_3 = arith.constant 0 : index
    %c17 = arith.constant 17 : index
    %c0_4 = arith.constant 0 : index
    %5 = vector.load %arg22[%c0_3, %c17, %c0_4] : memref<1x18x72xf32, #tpu.memory_space<vmem>>, vector<1x1x72xf32>
    %6 = vector.shape_cast %5 : vector<1x1x72xf32> to vector<1x72xf32>
    %7 = vector.shape_cast %0 : vector<1x72xf32> to vector<1x1x72xf32>
    tpu.vector_store %arg22[%c0_3, %c17, %c0_4], %7 {strides = array<i32>} : memref<1x18x72xf32, #tpu.memory_space<vmem>>, vector<1x1x72xf32>,
    %c0_5 = arith.constant 0 : index
    %c1 = arith.constant 1 : index
    %c0_6 = arith.constant 0 : index
    %8 = vector.load %arg22[%c0_5, %c1, %c0_6] : memref<1x18x72xf32, #tpu.memory_space<vmem>>, vector<1x16x4xf32>
    %9 = vector.shape_cast %8 : vector<1x16x4xf32> to vector<16x4xf32>
    %10 = vector.shape_cast %1 : vector<16x4xf32> to vector<1x16x4xf32>
    tpu.vector_store %arg22[%c0_5, %c1, %c0_6], %10 {strides = array<i32>} : memref<1x18x72xf32, #tpu.memory_space<vmem>>, vector<1x16x4xf32>,
    %c0_7 = arith.constant 0 : index
    %c1_8 = arith.constant 1 : index
    %c68 = arith.constant 68 : index
    %11 = vector.load %arg22[%c0_7, %c1_8, %c68] : memref<1x18x72xf32, #tpu.memory_space<vmem>>, vector<1x16x4xf32>
    %12 = vector.shape_cast %11 : vector<1x16x4xf32> to vector<16x4xf32>
    %13 = vector.shape_cast %1 : vector<16x4xf32> to vector<1x16x4xf32>
    tpu.vector_store %arg22[%c0_7, %c1_8, %c68], %13 {strides = array<i32>} : memref<1x18x72xf32, #tpu.memory_space<vmem>>, vector<1x16x4xf32>,
    %c0_9 = arith.constant 0 : index
    %c0_10 = arith.constant 0 : index
    %c0_11 = arith.constant 0 : index
    %14 = vector.load %arg1[%c0_9, %c0_10, %c0_11] : memref<1x16x64xf32, #tpu.memory_space<vmem>>, vector<1x16x64xf32>
    %15 = vector.shape_cast %14 : vector<1x16x64xf32> to vector<16x64xf32>
    %c0_12 = arith.constant 0 : index
    %c1_13 = arith.constant 1 : index
    %c4 = arith.constant 4 : index
    %16 = vector.load %arg22[%c0_12, %c1_13, %c4] : memref<1x18x72xf32, #tpu.memory_space<vmem>>, vector<1x16x64xf32>
    %17 = vector.shape_cast %16 : vector<1x16x64xf32> to vector<16x64xf32>
    %18 = vector.shape_cast %15 : vector<16x64xf32> to vector<1x16x64xf32>
    tpu.vector_store %arg22[%c0_12, %c1_13, %c4], %18 {strides = array<i32>} : memref<1x18x72xf32, #tpu.memory_space<vmem>>, vector<1x16x64xf32>,
    %cst_14 = arith.constant 0.000000e+00 : f32
    %19 = vector.broadcast %cst_14 : f32 to vector<16x512xf32>
    %c0_15 = arith.constant 0 : index
    %c0_16 = arith.constant 0 : index
    %c0_17 = arith.constant 0 : index
    %20 = vector.load %arg22[%c0_15, %c0_16, %c0_17] : memref<1x18x72xf32, #tpu.memory_space<vmem>>, vector<1x16x72xf32>
    %21 = vector.shape_cast %20 : vector<1x16x72xf32> to vector<16x72xf32>
    %22 = arith.truncf %21 : vector<16x72xf32> to vector<16x72xbf16>
    %c0_18 = arith.constant 0 : index
    %c0_19 = arith.constant 0 : index
    %c0_20 = arith.constant 0 : index
    %23 = vector.load %arg2[%c0_18, %c0_19, %c0_20] : memref<3x72x512xbf16, #tpu.memory_space<vmem>>, vector<1x72x512xbf16>
    %24 = vector.shape_cast %23 : vector<1x72x512xbf16> to vector<72x512xbf16>
    %cst_21 = arith.constant dense<0.000000e+00> : vector<16x512xf32>
    %25 = tpu.matmul %22, %24, %cst_21 {dimension_numbers = #tpu.dot_dimension_numbers<[1], [0], [0], [1], [0, 0, 1, 1], [], []>} : vector<16x72xbf16>, vector<72x512xbf16>, vector<16x512xf32> -> vector<16x512xf32>
    %26 = arith.addf %19, %25 : vector<16x512xf32>
    %c0_22 = arith.constant 0 : index
    %c1_23 = arith.constant 1 : index
    %c0_24 = arith.constant 0 : index
    %27 = vector.load %arg22[%c0_22, %c1_23, %c0_24] : memref<1x18x72xf32, #tpu.memory_space<vmem>>, vector<1x16x72xf32>
    %28 = vector.shape_cast %27 : vector<1x16x72xf32> to vector<16x72xf32>
    %29 = arith.truncf %28 : vector<16x72xf32> to vector<16x72xbf16>
    %c1_25 = arith.constant 1 : index
    %c0_26 = arith.constant 0 : index
    %c0_27 = arith.constant 0 : index
    %30 = vector.load %arg2[%c1_25, %c0_26, %c0_27] : memref<3x72x512xbf16, #tpu.memory_space<vmem>>, vector<1x72x512xbf16>
    %31 = vector.shape_cast %30 : vector<1x72x512xbf16> to vector<72x512xbf16>
    %cst_28 = arith.constant dense<0.000000e+00> : vector<16x512xf32>
    %32 = tpu.matmul %29, %31, %cst_28 {dimension_numbers = #tpu.dot_dimension_numbers<[1], [0], [0], [1], [0, 0, 1, 1], [], []>} : vector<16x72xbf16>, vector<72x512xbf16>, vector<16x512xf32> -> vector<16x512xf32>
    %33 = arith.addf %26, %32 : vector<16x512xf32>
    %c0_29 = arith.constant 0 : index
    %c2 = arith.constant 2 : index
    %c0_30 = arith.constant 0 : index
    %34 = vector.load %arg22[%c0_29, %c2, %c0_30] : memref<1x18x72xf32, #tpu.memory_space<vmem>>, vector<1x16x72xf32>
    %35 = vector.shape_cast %34 : vector<1x16x72xf32> to vector<16x72xf32>
    %36 = arith.truncf %35 : vector<16x72xf32> to vector<16x72xbf16>
    %c2_31 = arith.constant 2 : index
    %c0_32 = arith.constant 0 : index
    %c0_33 = arith.constant 0 : index
    %37 = vector.load %arg2[%c2_31, %c0_32, %c0_33] : memref<3x72x512xbf16, #tpu.memory_space<vmem>>, vector<1x72x512xbf16>
    %38 = vector.shape_cast %37 : vector<1x72x512xbf16> to vector<72x512xbf16>
    %cst_34 = arith.constant dense<0.000000e+00> : vector<16x512xf32>
    %39 = tpu.matmul %36, %38, %cst_34 {dimension_numbers = #tpu.dot_dimension_numbers<[1], [0], [0], [1], [0, 0, 1, 1], [], []>} : vector<16x72xbf16>, vector<72x512xbf16>, vector<16x512xf32> -> vector<16x512xf32>
    %40 = arith.addf %33, %39 : vector<16x512xf32>
    %c0_35 = arith.constant 0 : index
    %c0_36 = arith.constant 0 : index
    %41 = vector.load %arg3[%c0_35, %c0_36] : memref<1x512xf32, #tpu.memory_space<vmem>>, vector<1x512xf32>
    %42 = vector.broadcast %41 : vector<1x512xf32> to vector<16x512xf32>
    %43 = arith.mulf %40, %42 : vector<16x512xf32>
    %c0_37 = arith.constant 0 : index
    %c0_38 = arith.constant 0 : index
    %44 = vector.load %arg4[%c0_37, %c0_38] : memref<1x512xf32, #tpu.memory_space<vmem>>, vector<1x512xf32>
    %45 = vector.broadcast %44 : vector<1x512xf32> to vector<16x512xf32>
    %46 = arith.addf %43, %45 : vector<16x512xf32>
    %cst_39 = arith.constant 0.000000e+00 : f32
    %47 = vector.broadcast %cst_39 : f32 to vector<16x512xf32>
    %48 = arith.maximumf %46, %47 : vector<16x512xf32>
    %c0_40 = arith.constant 0 : index
    %c0_41 = arith.constant 0 : index
    %49 = vector.load %arg24[%c0_40, %c0_41] : memref<16x512xf32, #tpu.memory_space<vmem>>, vector<16x512xf32>
    tpu.vector_store %arg24[%c0_40, %c0_41], %48 {strides = array<i32>} : memref<16x512xf32, #tpu.memory_space<vmem>>, vector<16x512xf32>,
    %c0_42 = arith.constant 0 : index
    %c0_43 = arith.constant 0 : index
    %50 = vector.load %arg24[%c0_42, %c0_43] : memref<16x512xf32, #tpu.memory_space<vmem>>, vector<16x512xf32>
    %cst_44 = arith.constant dense<0.000000e+00> : vector<512xf32>
    %51 = vector.multi_reduction <add>, %50, %cst_44 [0] : vector<16x512xf32> to vector<512xf32>
    %52 = vector.shape_cast %51 : vector<512xf32> to vector<1x512xf32>
    %c0_45 = arith.constant 0 : index
    %c0_46 = arith.constant 0 : index
    %53 = vector.load %arg5[%c0_45, %c0_46] : memref<512x2xf32, #tpu.memory_space<vmem>>, vector<512x2xf32>
    %cst_47 = arith.constant dense<0.000000e+00> : vector<1x2xf32>
    %54 = tpu.matmul %52, %53, %cst_47 {dimension_numbers = #tpu.dot_dimension_numbers<[1], [0], [0], [1], [0, 0, 1, 1], [], []>} : vector<1x512xf32>, vector<512x2xf32>, vector<1x2xf32> -> vector<1x2xf32>
    %c0_48 = arith.constant 0 : index
    %c0_49 = arith.constant 0 : index
    %55 = vector.load %arg6[%c0_48, %c0_49] : memref<1x2xf32, #tpu.memory_space<vmem>>, vector<1x2xf32>
    %56 = arith.mulf %54, %55 : vector<1x2xf32>
    %c0_50 = arith.constant 0 : index
    %c0_51 = arith.constant 0 : index
    %57 = vector.load %arg7[%c0_50, %c0_51] : memref<1x2xf32, #tpu.memory_space<vmem>>, vector<1x2xf32>
    %58 = arith.addf %56, %57 : vector<1x2xf32>
    %cst_52 = arith.constant 0.000000e+00 : f32
    %59 = vector.broadcast %cst_52 : f32 to vector<1x2xf32>
    %60 = arith.maximumf %58, %59 : vector<1x2xf32>
    %c0_53 = arith.constant 0 : index
    %c0_54 = arith.constant 0 : index
    %61 = vector.load %arg8[%c0_53, %c0_54] : memref<2x512xf32, #tpu.memory_space<vmem>>, vector<2x512xf32>
    %cst_55 = arith.constant dense<0.000000e+00> : vector<1x512xf32>
    %62 = tpu.matmul %60, %61, %cst_55 {dimension_numbers = #tpu.dot_dimension_numbers<[1], [0], [0], [1], [0, 0, 1, 1], [], []>} : vector<1x2xf32>, vector<2x512xf32>, vector<1x512xf32> -> vector<1x512xf32>
    %c0_56 = arith.constant 0 : index
    %c0_57 = arith.constant 0 : index
    %63 = vector.load %arg9[%c0_56, %c0_57] : memref<1x512xf32, #tpu.memory_space<vmem>>, vector<1x512xf32>
    %64 = arith.addf %62, %63 : vector<1x512xf32>
    %c0_58 = arith.constant 0 : index
    %c0_59 = arith.constant 0 : index
    %65 = vector.load %arg24[%c0_58, %c0_59] : memref<16x512xf32, #tpu.memory_space<vmem>>, vector<16x512xf32>
    %66 = arith.truncf %65 : vector<16x512xf32> to vector<16x512xbf16>
    %c0_60 = arith.constant 0 : index
    %c0_61 = arith.constant 0 : index
    %67 = vector.load %arg10[%c0_60, %c0_61] : memref<512x32xbf16, #tpu.memory_space<vmem>>, vector<512x32xbf16>
    %cst_62 = arith.constant dense<0.000000e+00> : vector<16x32xf32>
    %68 = tpu.matmul %66, %67, %cst_62 {dimension_numbers = #tpu.dot_dimension_numbers<[1], [0], [0], [1], [0, 0, 1, 1], [], []>} : vector<16x512xbf16>, vector<512x32xbf16>, vector<16x32xf32> -> vector<16x32xf32>
    %c0_63 = arith.constant 0 : index
    %c0_64 = arith.constant 0 : index
    %69 = vector.load %arg11[%c0_63, %c0_64] : memref<1x32xf32, #tpu.memory_space<vmem>>, vector<1x32xf32>
    %70 = vector.broadcast %69 : vector<1x32xf32> to vector<16x32xf32>
    %71 = arith.mulf %68, %70 : vector<16x32xf32>
    %c0_65 = arith.constant 0 : index
    %c0_66 = arith.constant 0 : index
    %72 = vector.load %arg12[%c0_65, %c0_66] : memref<1x32xf32, #tpu.memory_space<vmem>>, vector<1x32xf32>
    %73 = vector.broadcast %72 : vector<1x32xf32> to vector<16x32xf32>
    %74 = arith.addf %71, %73 : vector<16x32xf32>
    %cst_67 = arith.constant 0.000000e+00 : f32
    %75 = vector.broadcast %cst_67 : f32 to vector<16x32xf32>
    %76 = arith.maximumf %74, %75 : vector<16x32xf32>
    %cst_68 = arith.constant 0.000000e+00 : f32
    %77 = vector.broadcast %cst_68 : f32 to vector<4x48xf32>
    %cst_69 = arith.constant 0.000000e+00 : f32
    %78 = vector.broadcast %cst_69 : f32 to vector<16x8xf32>
    %c0_70 = arith.constant 0 : index
    %c0_71 = arith.constant 0 : index
    %c0_72 = arith.constant 0 : index
    %79 = vector.load %arg23[%c0_70, %c0_71, %c0_72] : memref<1x24x48xf32, #tpu.memory_space<vmem>>, vector<1x4x48xf32>
    %80 = vector.shape_cast %79 : vector<1x4x48xf32> to vector<4x48xf32>
    %81 = vector.shape_cast %77 : vector<4x48xf32> to vector<1x4x48xf32>
    tpu.vector_store %arg23[%c0_70, %c0_71, %c0_72], %81 {strides = array<i32>} : memref<1x24x48xf32, #tpu.memory_space<vmem>>, vector<1x4x48xf32>,
    %c0_73 = arith.constant 0 : index
    %c20 = arith.constant 20 : index
    %c0_74 = arith.constant 0 : index
    %82 = vector.load %arg23[%c0_73, %c20, %c0_74] : memref<1x24x48xf32, #tpu.memory_space<vmem>>, vector<1x4x48xf32>
    %83 = vector.shape_cast %82 : vector<1x4x48xf32> to vector<4x48xf32>
    %84 = vector.shape_cast %77 : vector<4x48xf32> to vector<1x4x48xf32>
    tpu.vector_store %arg23[%c0_73, %c20, %c0_74], %84 {strides = array<i32>} : memref<1x24x48xf32, #tpu.memory_space<vmem>>, vector<1x4x48xf32>,
    %c0_75 = arith.constant 0 : index
    %c4_76 = arith.constant 4 : index
    %c0_77 = arith.constant 0 : index
    %85 = vector.load %arg23[%c0_75, %c4_76, %c0_77] : memref<1x24x48xf32, #tpu.memory_space<vmem>>, vector<1x16x8xf32>
    %86 = vector.shape_cast %85 : vector<1x16x8xf32> to vector<16x8xf32>
    %87 = vector.shape_cast %78 : vector<16x8xf32> to vector<1x16x8xf32>
    tpu.vector_store %arg23[%c0_75, %c4_76, %c0_77], %87 {strides = array<i32>} : memref<1x24x48xf32, #tpu.memory_space<vmem>>, vector<1x16x8xf32>,
    %c0_78 = arith.constant 0 : index
    %c4_79 = arith.constant 4 : index
    %c40 = arith.constant 40 : index
    %88 = vector.load %arg23[%c0_78, %c4_79, %c40] : memref<1x24x48xf32, #tpu.memory_space<vmem>>, vector<1x16x8xf32>
    %89 = vector.shape_cast %88 : vector<1x16x8xf32> to vector<16x8xf32>
    %90 = vector.shape_cast %78 : vector<16x8xf32> to vector<1x16x8xf32>
    tpu.vector_store %arg23[%c0_78, %c4_79, %c40], %90 {strides = array<i32>} : memref<1x24x48xf32, #tpu.memory_space<vmem>>, vector<1x16x8xf32>,
    %c0_80 = arith.constant 0 : index
    %c4_81 = arith.constant 4 : index
    %c8 = arith.constant 8 : index
    %91 = vector.load %arg23[%c0_80, %c4_81, %c8] : memref<1x24x48xf32, #tpu.memory_space<vmem>>, vector<1x16x32xf32>
    %92 = vector.shape_cast %91 : vector<1x16x32xf32> to vector<16x32xf32>
    %93 = vector.shape_cast %76 : vector<16x32xf32> to vector<1x16x32xf32>
    tpu.vector_store %arg23[%c0_80, %c4_81, %c8], %93 {strides = array<i32>} : memref<1x24x48xf32, #tpu.memory_space<vmem>>, vector<1x16x32xf32>,
    %cst_82 = arith.constant 0.000000e+00 : f32
    %94 = vector.broadcast %cst_82 : f32 to vector<16x32xf32>
    %c0_83 = arith.constant 0 : index
    %c0_84 = arith.constant 0 : index
    %c0_85 = arith.constant 0 : index
    %95 = vector.load %arg23[%c0_83, %c0_84, %c0_85] : memref<1x24x48xf32, #tpu.memory_space<vmem>>, vector<1x16x48xf32>
    %96 = vector.shape_cast %95 : vector<1x16x48xf32> to vector<16x48xf32>
    %97 = arith.truncf %96 : vector<16x48xf32> to vector<16x48xbf16>
    %c0_86 = arith.constant 0 : index
    %c0_87 = arith.constant 0 : index
    %c0_88 = arith.constant 0 : index
    %98 = vector.load %arg13[%c0_86, %c0_87, %c0_88] : memref<3x48x32xbf16, #tpu.memory_space<vmem>>, vector<1x48x32xbf16>
    %99 = vector.shape_cast %98 : vector<1x48x32xbf16> to vector<48x32xbf16>
    %cst_89 = arith.constant dense<0.000000e+00> : vector<16x32xf32>
    %100 = tpu.matmul %97, %99, %cst_89 {dimension_numbers = #tpu.dot_dimension_numbers<[1], [0], [0], [1], [0, 0, 1, 1], [], []>} : vector<16x48xbf16>, vector<48x32xbf16>, vector<16x32xf32> -> vector<16x32xf32>
    %101 = arith.addf %94, %100 : vector<16x32xf32>
    %c0_90 = arith.constant 0 : index
    %c4_91 = arith.constant 4 : index
    %c0_92 = arith.constant 0 : index
    %102 = vector.load %arg23[%c0_90, %c4_91, %c0_92] : memref<1x24x48xf32, #tpu.memory_space<vmem>>, vector<1x16x48xf32>
    %103 = vector.shape_cast %102 : vector<1x16x48xf32> to vector<16x48xf32>
    %104 = arith.truncf %103 : vector<16x48xf32> to vector<16x48xbf16>
    %c1_93 = arith.constant 1 : index
    %c0_94 = arith.constant 0 : index
    %c0_95 = arith.constant 0 : index
    %105 = vector.load %arg13[%c1_93, %c0_94, %c0_95] : memref<3x48x32xbf16, #tpu.memory_space<vmem>>, vector<1x48x32xbf16>
    %106 = vector.shape_cast %105 : vector<1x48x32xbf16> to vector<48x32xbf16>
    %cst_96 = arith.constant dense<0.000000e+00> : vector<16x32xf32>
    %107 = tpu.matmul %104, %106, %cst_96 {dimension_numbers = #tpu.dot_dimension_numbers<[1], [0], [0], [1], [0, 0, 1, 1], [], []>} : vector<16x48xbf16>, vector<48x32xbf16>, vector<16x32xf32> -> vector<16x32xf32>
    %108 = arith.addf %101, %107 : vector<16x32xf32>
    %c0_97 = arith.constant 0 : index
    %c8_98 = arith.constant 8 : index
    %c0_99 = arith.constant 0 : index
    %109 = vector.load %arg23[%c0_97, %c8_98, %c0_99] : memref<1x24x48xf32, #tpu.memory_space<vmem>>, vector<1x16x48xf32>
    %110 = vector.shape_cast %109 : vector<1x16x48xf32> to vector<16x48xf32>
    %111 = arith.truncf %110 : vector<16x48xf32> to vector<16x48xbf16>
    %c2_100 = arith.constant 2 : index
    %c0_101 = arith.constant 0 : index
    %c0_102 = arith.constant 0 : index
    %112 = vector.load %arg13[%c2_100, %c0_101, %c0_102] : memref<3x48x32xbf16, #tpu.memory_space<vmem>>, vector<1x48x32xbf16>
    %113 = vector.shape_cast %112 : vector<1x48x32xbf16> to vector<48x32xbf16>
    %cst_103 = arith.constant dense<0.000000e+00> : vector<16x32xf32>
    %114 = tpu.matmul %111, %113, %cst_103 {dimension_numbers = #tpu.dot_dimension_numbers<[1], [0], [0], [1], [0, 0, 1, 1], [], []>} : vector<16x48xbf16>, vector<48x32xbf16>, vector<16x32xf32> -> vector<16x32xf32>
    %115 = arith.addf %108, %114 : vector<16x32xf32>
    %c0_104 = arith.constant 0 : index
    %c0_105 = arith.constant 0 : index
    %116 = vector.load %arg14[%c0_104, %c0_105] : memref<1x32xf32, #tpu.memory_space<vmem>>, vector<1x32xf32>
    %117 = vector.broadcast %116 : vector<1x32xf32> to vector<16x32xf32>
    %118 = arith.mulf %115, %117 : vector<16x32xf32>
    %c0_106 = arith.constant 0 : index
    %c0_107 = arith.constant 0 : index
    %119 = vector.load %arg15[%c0_106, %c0_107] : memref<1x32xf32, #tpu.memory_space<vmem>>, vector<1x32xf32>
    %120 = vector.broadcast %119 : vector<1x32xf32> to vector<16x32xf32>
    %121 = arith.addf %118, %120 : vector<16x32xf32>
    %cst_108 = arith.constant 0.000000e+00 : f32
    %122 = vector.broadcast %cst_108 : f32 to vector<16x32xf32>
    %123 = arith.maximumf %121, %122 : vector<16x32xf32>
    %c0_109 = arith.constant 0 : index
    %c4_110 = arith.constant 4 : index
    %c8_111 = arith.constant 8 : index
    %124 = vector.load %arg23[%c0_109, %c4_110, %c8_111] : memref<1x24x48xf32, #tpu.memory_space<vmem>>, vector<1x16x32xf32>
    %125 = vector.shape_cast %124 : vector<1x16x32xf32> to vector<16x32xf32>
    %126 = vector.shape_cast %123 : vector<16x32xf32> to vector<1x16x32xf32>
    tpu.vector_store %arg23[%c0_109, %c4_110, %c8_111], %126 {strides = array<i32>} : memref<1x24x48xf32, #tpu.memory_space<vmem>>, vector<1x16x32xf32>,
    %cst_112 = arith.constant 0.000000e+00 : f32
    %127 = vector.broadcast %cst_112 : f32 to vector<16x32xf32>
    %c0_113 = arith.constant 0 : index
    %c0_114 = arith.constant 0 : index
    %c0_115 = arith.constant 0 : index
    %128 = vector.load %arg23[%c0_113, %c0_114, %c0_115] : memref<1x24x48xf32, #tpu.memory_space<vmem>>, vector<1x16x48xf32>
    %129 = vector.shape_cast %128 : vector<1x16x48xf32> to vector<16x48xf32>
    %130 = arith.truncf %129 : vector<16x48xf32> to vector<16x48xbf16>
    %c0_116 = arith.constant 0 : index
    %c0_117 = arith.constant 0 : index
    %c0_118 = arith.constant 0 : index
    %131 = vector.load %arg16[%c0_116, %c0_117, %c0_118] : memref<3x48x32xbf16, #tpu.memory_space<vmem>>, vector<1x48x32xbf16>
    %132 = vector.shape_cast %131 : vector<1x48x32xbf16> to vector<48x32xbf16>
    %cst_119 = arith.constant dense<0.000000e+00> : vector<16x32xf32>
    %133 = tpu.matmul %130, %132, %cst_119 {dimension_numbers = #tpu.dot_dimension_numbers<[1], [0], [0], [1], [0, 0, 1, 1], [], []>} : vector<16x48xbf16>, vector<48x32xbf16>, vector<16x32xf32> -> vector<16x32xf32>
    %134 = arith.addf %127, %133 : vector<16x32xf32>
    %c0_120 = arith.constant 0 : index
    %c4_121 = arith.constant 4 : index
    %c0_122 = arith.constant 0 : index
    %135 = vector.load %arg23[%c0_120, %c4_121, %c0_122] : memref<1x24x48xf32, #tpu.memory_space<vmem>>, vector<1x16x48xf32>
    %136 = vector.shape_cast %135 : vector<1x16x48xf32> to vector<16x48xf32>
    %137 = arith.truncf %136 : vector<16x48xf32> to vector<16x48xbf16>
    %c1_123 = arith.constant 1 : index
    %c0_124 = arith.constant 0 : index
    %c0_125 = arith.constant 0 : index
    %138 = vector.load %arg16[%c1_123, %c0_124, %c0_125] : memref<3x48x32xbf16, #tpu.memory_space<vmem>>, vector<1x48x32xbf16>
    %139 = vector.shape_cast %138 : vector<1x48x32xbf16> to vector<48x32xbf16>
    %cst_126 = arith.constant dense<0.000000e+00> : vector<16x32xf32>
    %140 = tpu.matmul %137, %139, %cst_126 {dimension_numbers = #tpu.dot_dimension_numbers<[1], [0], [0], [1], [0, 0, 1, 1], [], []>} : vector<16x48xbf16>, vector<48x32xbf16>, vector<16x32xf32> -> vector<16x32xf32>
    %141 = arith.addf %134, %140 : vector<16x32xf32>
    %c0_127 = arith.constant 0 : index
    %c8_128 = arith.constant 8 : index
    %c0_129 = arith.constant 0 : index
    %142 = vector.load %arg23[%c0_127, %c8_128, %c0_129] : memref<1x24x48xf32, #tpu.memory_space<vmem>>, vector<1x16x48xf32>
    %143 = vector.shape_cast %142 : vector<1x16x48xf32> to vector<16x48xf32>
    %144 = arith.truncf %143 : vector<16x48xf32> to vector<16x48xbf16>
    %c2_130 = arith.constant 2 : index
    %c0_131 = arith.constant 0 : index
    %c0_132 = arith.constant 0 : index
    %145 = vector.load %arg16[%c2_130, %c0_131, %c0_132] : memref<3x48x32xbf16, #tpu.memory_space<vmem>>, vector<1x48x32xbf16>
    %146 = vector.shape_cast %145 : vector<1x48x32xbf16> to vector<48x32xbf16>
    %cst_133 = arith.constant dense<0.000000e+00> : vector<16x32xf32>
    %147 = tpu.matmul %144, %146, %cst_133 {dimension_numbers = #tpu.dot_dimension_numbers<[1], [0], [0], [1], [0, 0, 1, 1], [], []>} : vector<16x48xbf16>, vector<48x32xbf16>, vector<16x32xf32> -> vector<16x32xf32>
    %148 = arith.addf %141, %147 : vector<16x32xf32>
    %c0_134 = arith.constant 0 : index
    %c0_135 = arith.constant 0 : index
    %149 = vector.load %arg17[%c0_134, %c0_135] : memref<1x32xf32, #tpu.memory_space<vmem>>, vector<1x32xf32>
    %150 = vector.broadcast %149 : vector<1x32xf32> to vector<16x32xf32>
    %151 = arith.mulf %148, %150 : vector<16x32xf32>
    %c0_136 = arith.constant 0 : index
    %c0_137 = arith.constant 0 : index
    %152 = vector.load %arg18[%c0_136, %c0_137] : memref<1x32xf32, #tpu.memory_space<vmem>>, vector<1x32xf32>
    %153 = vector.broadcast %152 : vector<1x32xf32> to vector<16x32xf32>
    %154 = arith.addf %151, %153 : vector<16x32xf32>
    %cst_138 = arith.constant 0.000000e+00 : f32
    %155 = vector.broadcast %cst_138 : f32 to vector<16x32xf32>
    %156 = arith.maximumf %154, %155 : vector<16x32xf32>
    %157 = arith.truncf %156 : vector<16x32xf32> to vector<16x32xbf16>
    %c0_139 = arith.constant 0 : index
    %c0_140 = arith.constant 0 : index
    %158 = vector.load %arg19[%c0_139, %c0_140] : memref<32x512xbf16, #tpu.memory_space<vmem>>, vector<32x512xbf16>
    %cst_141 = arith.constant dense<0.000000e+00> : vector<16x512xf32>
    %159 = tpu.matmul %157, %158, %cst_141 {dimension_numbers = #tpu.dot_dimension_numbers<[1], [0], [0], [1], [0, 0, 1, 1], [], []>} : vector<16x32xbf16>, vector<32x512xbf16>, vector<16x512xf32> -> vector<16x512xf32>
    %c0_142 = arith.constant 0 : index
    %c0_143 = arith.constant 0 : index
    %160 = vector.load %arg20[%c0_142, %c0_143] : memref<1x1xf32, #tpu.memory_space<vmem>>, vector<1x1xf32>
    %161 = vector.broadcast %160 : vector<1x1xf32> to vector<16x512xf32>
    %162 = arith.addf %159, %161 : vector<16x512xf32>
    %163 = vector.broadcast %64 : vector<1x512xf32> to vector<16x512xf32>
    %164 = arith.mulf %163, %162 : vector<16x512xf32>
    %cst_144 = arith.constant 0.000000e+00 : f32
    %165 = vector.broadcast %cst_144 : f32 to vector<16x512xf32>
    %166 = arith.subf %165, %164 : vector<16x512xf32>
    %167 = math.exp %166 : vector<16x512xf32>
    %cst_145 = arith.constant 1.000000e+00 : f32
    %168 = vector.broadcast %cst_145 : f32 to vector<16x512xf32>
    %169 = arith.addf %168, %167 : vector<16x512xf32>
    %cst_146 = arith.constant 1.000000e+00 : f32
    %170 = vector.broadcast %cst_146 : f32 to vector<16x512xf32>
    %171 = arith.divf %170, %169 : vector<16x512xf32>
    %cst_147 = arith.constant 1.000000e+00 : f32
    %172 = vector.broadcast %cst_147 : f32 to vector<16x512xf32>
    %173 = arith.addf %172, %171 : vector<16x512xf32>
    %c0_148 = arith.constant 0 : index
    %c0_149 = arith.constant 0 : index
    %174 = vector.load %arg24[%c0_148, %c0_149] : memref<16x512xf32, #tpu.memory_space<vmem>>, vector<16x512xf32>
    %175 = arith.mulf %173, %174 : vector<16x512xf32>
    %c0_150 = arith.constant 0 : index
    %c0_151 = arith.constant 0 : index
    %c0_152 = arith.constant 0 : index
    %176 = vector.load %arg21[%c0_150, %c0_151, %c0_152] : memref<1x16x512xf32, #tpu.memory_space<vmem>>, vector<1x16x512xf32>
    %177 = vector.shape_cast %176 : vector<1x16x512xf32> to vector<16x512xf32>
    %178 = vector.shape_cast %175 : vector<16x512xf32> to vector<1x16x512xf32>
    tpu.vector_store %arg21[%c0_150, %c0_151, %c0_152], %178 {strides = array<i32>} : memref<1x16x512xf32, #tpu.memory_space<vmem>>, vector<1x16x512xf32>,
    return
  }
  func.func @transform_0(%arg0: i32) -> (i32, i32, i32) {
    %c0_i32 = arith.constant 0 : i32
    %c0_i32_0 = arith.constant 0 : i32
    %c0_i32_1 = arith.constant 0 : i32
    return %arg0, %c0_i32, %c0_i32_0 : i32, i32, i32
  }
  func.func @transform_1(%arg0: i32) -> (i32, i32, i32) {
    %c0_i32 = arith.constant 0 : i32
    %c0_i32_0 = arith.constant 0 : i32
    %c0_i32_1 = arith.constant 0 : i32
    %c0_i32_2 = arith.constant 0 : i32
    return %c0_i32, %c0_i32_0, %c0_i32_1 : i32, i32, i32
  }
  func.func @transform_2(%arg0: i32) -> (i32, i32) {
    %c0_i32 = arith.constant 0 : i32
    %c0_i32_0 = arith.constant 0 : i32
    %c0_i32_1 = arith.constant 0 : i32
    return %c0_i32, %c0_i32_0 : i32, i32
  }
  func.func @transform_3(%arg0: i32) -> (i32, i32) {
    %c0_i32 = arith.constant 0 : i32
    %c0_i32_0 = arith.constant 0 : i32
    %c0_i32_1 = arith.constant 0 : i32
    return %c0_i32, %c0_i32_0 : i32, i32
  }
  func.func @transform_4(%arg0: i32) -> (i32, i32) {
    %c0_i32 = arith.constant 0 : i32
    %c0_i32_0 = arith.constant 0 : i32
    %c0_i32_1 = arith.constant 0 : i32
    return %c0_i32, %c0_i32_0 : i32, i32
  }
  func.func @transform_5(%arg0: i32) -> (i32, i32) {
    %c0_i32 = arith.constant 0 : i32
    %c0_i32_0 = arith.constant 0 : i32
    %c0_i32_1 = arith.constant 0 : i32
    return %c0_i32, %c0_i32_0 : i32, i32
  }
  func.func @transform_6(%arg0: i32) -> (i32, i32) {
    %c0_i32 = arith.constant 0 : i32
    %c0_i32_0 = arith.constant 0 : i32
    %c0_i32_1 = arith.constant 0 : i32
    return %c0_i32, %c0_i32_0 : i32, i32
  }
  func.func @transform_7(%arg0: i32) -> (i32, i32) {
    %c0_i32 = arith.constant 0 : i32
    %c0_i32_0 = arith.constant 0 : i32
    %c0_i32_1 = arith.constant 0 : i32
    return %c0_i32, %c0_i32_0 : i32, i32
  }
  func.func @transform_8(%arg0: i32) -> (i32, i32) {
    %c0_i32 = arith.constant 0 : i32
    %c0_i32_0 = arith.constant 0 : i32
    %c0_i32_1 = arith.constant 0 : i32
    return %c0_i32, %c0_i32_0 : i32, i32
  }
  func.func @transform_9(%arg0: i32) -> (i32, i32) {
    %c0_i32 = arith.constant 0 : i32
    %c0_i32_0 = arith.constant 0 : i32
    %c0_i32_1 = arith.constant 0 : i32
    return %c0_i32, %c0_i32_0 : i32, i32
  }
  func.func @transform_10(%arg0: i32) -> (i32, i32) {
    %c0_i32 = arith.constant 0 : i32
    %c0_i32_0 = arith.constant 0 : i32
    %c0_i32_1 = arith.constant 0 : i32
    return %c0_i32, %c0_i32_0 : i32, i32
  }
  func.func @transform_11(%arg0: i32) -> (i32, i32) {
    %c0_i32 = arith.constant 0 : i32
    %c0_i32_0 = arith.constant 0 : i32
    %c0_i32_1 = arith.constant 0 : i32
    return %c0_i32, %c0_i32_0 : i32, i32
  }
  func.func @transform_12(%arg0: i32) -> (i32, i32, i32) {
    %c0_i32 = arith.constant 0 : i32
    %c0_i32_0 = arith.constant 0 : i32
    %c0_i32_1 = arith.constant 0 : i32
    %c0_i32_2 = arith.constant 0 : i32
    return %c0_i32, %c0_i32_0, %c0_i32_1 : i32, i32, i32
  }
  func.func @transform_13(%arg0: i32) -> (i32, i32) {
    %c0_i32 = arith.constant 0 : i32
    %c0_i32_0 = arith.constant 0 : i32
    %c0_i32_1 = arith.constant 0 : i32
    return %c0_i32, %c0_i32_0 : i32, i32
  }
  func.func @transform_14(%arg0: i32) -> (i32, i32) {
    %c0_i32 = arith.constant 0 : i32
    %c0_i32_0 = arith.constant 0 : i32
    %c0_i32_1 = arith.constant 0 : i32
    return %c0_i32, %c0_i32_0 : i32, i32
  }
  func.func @transform_15(%arg0: i32) -> (i32, i32, i32) {
    %c0_i32 = arith.constant 0 : i32
    %c0_i32_0 = arith.constant 0 : i32
    %c0_i32_1 = arith.constant 0 : i32
    %c0_i32_2 = arith.constant 0 : i32
    return %c0_i32, %c0_i32_0, %c0_i32_1 : i32, i32, i32
  }
  func.func @transform_16(%arg0: i32) -> (i32, i32) {
    %c0_i32 = arith.constant 0 : i32
    %c0_i32_0 = arith.constant 0 : i32
    %c0_i32_1 = arith.constant 0 : i32
    return %c0_i32, %c0_i32_0 : i32, i32
  }
  func.func @transform_17(%arg0: i32) -> (i32, i32) {
    %c0_i32 = arith.constant 0 : i32
    %c0_i32_0 = arith.constant 0 : i32
    %c0_i32_1 = arith.constant 0 : i32
    return %c0_i32, %c0_i32_0 : i32, i32
  }
  func.func @transform_18(%arg0: i32) -> (i32, i32) {
    %c0_i32 = arith.constant 0 : i32
    %c0_i32_0 = arith.constant 0 : i32
    %c0_i32_1 = arith.constant 0 : i32
    return %c0_i32, %c0_i32_0 : i32, i32
  }
  func.func @transform_19(%arg0: i32) -> (i32, i32) {
    %c0_i32 = arith.constant 0 : i32
    %c0_i32_0 = arith.constant 0 : i32
    %c0_i32_1 = arith.constant 0 : i32
    return %c0_i32, %c0_i32_0 : i32, i32
  }
  func.func @transform_20(%arg0: i32) -> (i32, i32, i32) {
    %c0_i32 = arith.constant 0 : i32
    %c0_i32_0 = arith.constant 0 : i32
    %c0_i32_1 = arith.constant 0 : i32
    return %arg0, %c0_i32, %c0_i32_0 : i32, i32, i32
  }
}

</mosaic_0001>

<bundles_post_ra>
// kernel: tile.51
= control target key start
LH: loop header
LB: loop body
LE: loop exit
PB: predicated region body
PF: predicated region fallthrough
CT: control target
= control target key end

     0   :  { %s8_s6 = smov 3  ;;  %s11_s7 = smov 12  ;;  %vm13_vm0 = vcmask 1043458   ;;  %vm18_vm1 = vcmask 1045508   ;;  %vm23_vm2 = vcmask 1047558   ;;  %vm3_vm3 = vcmask 261120   ;;  %s207_s0 = inlined_call_operand.vmem [shape: f32[2,16,32], index: 0, kind: input, shape index: {}]   ;;  %s208_s1 = inlined_call_operand.vmem [shape: f32[2,512], index: 1, kind: output, shape index: {}]  }
   0x1   :  { %v116_v0 = vld [vmem:[%s207_s0 + $0x3] ss:$16 sm:%s8_s6]   ;;  %v117_v1 = vld [vmem:[%s207_s0 - $0x19] ss:$16 sm:%s11_s7]   ;;  %s16_s12 = smov 48  ;;  %s21_s13 = smov 192 }
   0x2   :  { %v14_v2 = vsel %vm13_vm0, %v117_v1, %v116_v0  ;;  %v118_v3 = vld [vmem:[%s207_s0 - $0x35] ss:$16 sm:%s16_s12]   ;;  %v119_v4 = vld [vmem:[%s207_s0 - $0x51] ss:$16 sm:%s21_s13]   ;;  %s36_s18 = smov 3  ;;  %s39_s21 = smov 12 }
   0x3   :  { %v19_v5 = vsel %vm18_vm1, %v118_v3, %v14_v2  ;;  %v120_v6 = vld [vmem:[%s207_s0 + $0x2] ss:$16 sm:%s36_s18]   ;;  %s44_s22 = smov 48  ;;  %v2_v7 = vld [vmem:[%s207_s0] ss:$4 sm:$0xff]   ;;  %s49_s29 = smov 192 }
   0x4   :  { %v24_v8 = vsel %vm23_vm2, %v119_v4, %v19_v5  ;;  %v121_v9 = vld [vmem:[%s207_s0 - $0x1a] ss:$16 sm:%s39_s21]   ;;  %v122_v10 = vld [vmem:[%s207_s0 - $0x36] ss:$16 sm:%s44_s22]   ;;  %s134_s30 = smov 96   ;;  %s64_s4 = smov 3 }
   0x5   :  { %25 = vrot.lane.b32.xlu0 %v24_v8, %s134_s30  ;;  %v42_v11 = vsel %vm13_vm0, %v121_v9, %v120_v6  ;;  %v123_v12 = vld [vmem:[%s207_s0 - $0x52] ss:$16 sm:%s49_s29]   ;;  %s67_s5 = smov 12  ;;  %s72_s10 = smov 48  ;;  %vm27_vm4 = vcmask 1048320   ;;  %vm55_vm5 = vcmask 785920  }
   0x6   :  { %v47_v13 = vsel %vm18_vm1, %v122_v10, %v42_v11  ;;  %v124_v14 = vld [vmem:[%s207_s0 + $0x1] ss:$16 sm:%s64_s4]   ;;  %v125_v15 = vld [vmem:[%s207_s0 - $0x1b] ss:$16 sm:%s67_s5]   ;;  %s77_s11 = smov 192  ;;  %s136_s16 = smov 32  }
   0x7   :  { %4 = vst.msk [vmem:[#allocation0] ss:$8 sm:$0xf] %vm3_vm3, %v2_v7   ;;  %6 = vst.msk [vmem:[#allocation0 - $0x1f] ss:$8 sm:$0xf0] %vm3_vm3, %v2_v7   ;;  %v52_v16 = vsel %vm23_vm2, %v123_v12, %v47_v13  ;;  %v70_v17 = vsel %vm13_vm0, %v125_v15, %v124_v14 }
   0x8   :  { %v126_v18 = vld [vmem:[%s207_s0 - $0x37] ss:$16 sm:%s72_s10]   ;;  %v127_v19 = vld [vmem:[%s207_s0 - $0x53] ss:$16 sm:%s77_s11]   ;;  %s135_s0 = smov 64   ;;  %vm83_vm6 = vcmask 523520  }
   0x9   :  { %v75_v20 = vsel %vm18_vm1, %v126_v18, %v70_v17  ;;  %53 = vrot.lane.b32.xlu0 %v52_v16, %s135_s0 }
   0xa   :  { %v80_v21 = vsel %vm23_vm2, %v127_v19, %v75_v20 }
   0xb   :  { %81 = vrot.lane.b32.xlu1 %v80_v21, %s136_s16 }
  0x77   :  { %v26_v22 = vpop.permute.xlu0 %25  }
  0x78   :  { %28 = vst.msk [vmem:[#allocation0] sm:$0x3] %vm27_vm4, %v26_v22   ;;  %30 = vst.msk [vmem:[#allocation0 + $0x6] sm:$0xc] %vm27_vm4, %v26_v22  }
  0x79   :  { %32 = vst.msk [vmem:[#allocation0 + $0xc] sm:$0x30] %vm27_vm4, %v26_v22   ;;  %34 = vst.msk [vmem:[#allocation0 + $0x12] sm:$0xc0] %vm27_vm4, %v26_v22  }
  0x7b   :  { %v54_v23 = vpop.permute.xlu0 %53  }
  0x7c   :  { %56 = vst.msk [vmem:[#allocation0] sm:$0x3] %vm55_vm5, %v54_v23   ;;  %58 = vst.msk [vmem:[#allocation0 + $0x6] sm:$0xc] %vm55_vm5, %v54_v23  }
  0x7d   :  { %60 = vst.msk [vmem:[#allocation0 + $0xc] sm:$0x30] %vm55_vm5, %v54_v23   ;;  %62 = vst.msk [vmem:[#allocation0 + $0x12] sm:$0xc0] %vm55_vm5, %v54_v23   ;;  %v82_v24 = vpop.permute.xlu1 %81  }
  0x7e   :  { %84 = vst.msk [vmem:[#allocation0] sm:$0x3] %vm83_vm6, %v82_v24   ;;  %86 = vst.msk [vmem:[#allocation0 + $0x6] sm:$0xc] %vm83_vm6, %v82_v24  }
  0x7f   :  { %88 = vst.msk [vmem:[#allocation0 + $0xc] sm:$0x30] %vm83_vm6, %v82_v24   ;;  %90 = vst.msk [vmem:[#allocation0 + $0x12] sm:$0xc0] %vm83_vm6, %v82_v24  }
  0x85   :  { %v94_v25 = vld [vmem:[#allocation0] sm:$0x3]  ;;  %v98_v26 = vld [vmem:[#allocation0 + $0x8] sm:$0x3] }
  0x86   :  { %v103_v27 = vld [vmem:[#allocation0 + $0x10] sm:$0x3]  ;;  %96 = vst [vmem:[%s208_s1] sm:$0x3] %v94_v25  ;;  %128 = vst [vmem:[%s208_s1 + $0x2] sm:$0x3] %v98_v26 }
  0x87   :  { %129 = vst [vmem:[%s208_s1 + $0x4] sm:$0x3] %v103_v27  ;;  %v109_v28 = vld [vmem:[#allocation0 + $0x18] sm:$0x3] }
  0x88   :  { %130 = vst [vmem:[%s208_s1 + $0x6] sm:$0x3] %v109_v28 }

// kernel: _lambda_.1
= control target key start
LH: loop header
LB: loop body
LE: loop exit
PB: predicated region body
PF: predicated region fallthrough
CT: control target
= control target key end

     0   :  { %s3828_s23 = smov 0   ;;  %s4584_s0 = inlined_call_operand.vmem [shape: f32[2,16,64], index: 0, kind: input, shape index: {}]   ;;  %s4585_s1 = inlined_call_operand.vmem [shape: bf16[3,72,512], index: 1, kind: input, shape index: {}]   ;;  %s4586_s2 = inlined_call_operand.vmem [shape: f32[1,512], index: 2, kind: input, shape index: {}]   ;;  %s4587_s3 = inlined_call_operand.vmem [shape: f32[1,512], index: 3, kind: input, shape index: {}]   ;;  %s4588_s4 = inlined_call_operand.vmem [shape: f32[512,2], index: 4, kind: input, shape index: {}]   ;;  %s4589_s5 = inlined_call_operand.vmem [shape: f32[1,2], index: 5, kind: input, shape index: {}]   ;;  %s4590_s6 = inlined_call_operand.vmem [shape: f32[1,2], index: 6, kind: input, shape index: {}]   ;;  %s4591_s7 = inlined_call_operand.vmem [shape: f32[2,512], index: 7, kind: input, shape index: {}]   ;;  %s4592_s8 = inlined_call_operand.vmem [shape: f32[1,512], index: 8, kind: input, shape index: {}]   ;;  %s4593_s9 = inlined_call_operand.vmem [shape: bf16[512,32], index: 9, kind: input, shape index: {}]   ;;  %s4594_s10 = inlined_call_operand.vmem [shape: f32[1,32], index: 10, kind: input, shape index: {}]   ;;  %s4595_s11 = inlined_call_operand.vmem [shape: f32[1,32], index: 11, kind: input, shape index: {}]   ;;  %s4596_s12 = inlined_call_operand.vmem [shape: bf16[3,48,32], index: 12, kind: input, shape index: {}]   ;;  %s4597_s13 = inlined_call_operand.vmem [shape: f32[1,32], index: 13, kind: input, shape index: {}]   ;;  %s4598_s14 = inlined_call_operand.vmem [shape: f32[1,32], index: 14, kind: input, shape index: {}]   ;;  %s4599_s15 = inlined_call_operand.vmem [shape: bf16[3,48,32], index: 15, kind: input, shape index: {}]   ;;  %s4600_s16 = inlined_call_operand.vmem [shape: f32[1,32], index: 16, kind: input, shape index: {}]   ;;  %s4601_s17 = inlined_call_operand.vmem [shape: f32[1,32], index: 17, kind: input, shape index: {}]   ;;  %s4602_s18 = inlined_call_operand.vmem [shape: bf16[32,512], index: 18, kind: input, shape index: {}]   ;;  %s4603_s19 = inlined_call_operand.<no memory space> [shape: f32[1,1], index: 19, kind: input, shape index: {}]   ;;  %s4604_s20 = inlined_call_operand.vmem [shape: f32[2,16,512], index: 20, kind: output, shape index: {}]  }
   0x1   :  { %4607 = sst [smem:[#allocation6_spill]] %s4584_s0  ;;  %v25_v0 = vstv %s4603_s19 }
   0x2   :  { %4608 = sst [smem:[#allocation7_spill]] %s4585_s1  ;;  %26 = vst [vmem:[#allocation5] sm:$0x1] %v25_v0 }
   0x3   :  { %4609 = sst [smem:[#allocation8_spill]] %s4586_s2 }
   0x4   :  { %4610 = sst [smem:[#allocation9_spill]] %s4587_s3 }
   0x5   :  { %4611 = sst [smem:[#allocation10_spill]] %s4588_s4 }
   0x6 LB: > { %s2995_s24 = sadd.s32 4294967295, %s3712_s23   ;;  %p2999_p0 = scmp.ge.s32.totalorder %s3712_s23, 1  ;;  %s3712_s23 = sphi %s3828_s23, %s32_s23  }
   0x7   : > { %p564_p1 = scmp.lt.s32.totalorder %s3712_s23, 3 }
   0x9   : > { %p565_p2 = pnand %p2999_p0, %p564_p1 }
   0xa   : > { %p622_p3 = scmp.lt.s32.totalorder (!%p565_p2), %s2995_s24, 1  ;;  %s4612_s19 = sld [smem:[#allocation7_spill]] (!%p565_p2)  ;;  %vm636_vm0 = vcmask (!%p565_p2), 31744   ;;  %v3714_v5 = vmov (!%p565_p2), 0.0   ;;  %vm639_vm1 = vcmask (!%p565_p2), 589344   ;;  %v3716_v16 = vmov (!%p565_p2), 0  }
   0xb   : > { %568 = sbr.rel (%p565_p2) target bundleno = 1905 (0x771), region = 100  ;;  %637 = vst.msk [vmem:[#allocation2 + $0x1] sm:$0xff] (!%p565_p2), %vm636_vm0, %v3714_v5  ;;  %638 = vst.msk [vmem:[#allocation2 + $0x9] sm:$0xff] (!%p565_p2), %vm636_vm0, %v3714_v5  ;;  %s4613_s27 = sld [smem:[#allocation6_spill]] (!%p565_p2)  ;;  %837 = vmatprep.mubr.bf16.mxu0 (!%p565_p2), %v3716_v16  ;;  %vm633_vm2 = vcmask (!%p565_p2), 581632   ;;  %880 = vmatprep.mubr.bf16.mxu1 (!%p565_p2), %v3716_v16  ;;  %vm792_vm3 = vcmask (!%p565_p2), 1043456  }
   0xc   : > { %640 = vst.msk [vmem:[#allocation2 + $0x1] sm:$0xff] (!%p565_p2), %vm639_vm1, %v3714_v5  ;;  %641 = vst.msk [vmem:[#allocation2 + $0x9] sm:$0xff] (!%p565_p2), %vm639_vm1, %v3714_v5  ;;  %3527 = vset.pattern.permute.xlu0 (!%p565_p2), %v3716_v16  ;;  %vm652_vm4 = vcmask (!%p565_p2), 556064   ;;  %vm788_vm5 = vcmask (!%p565_p2), 588800   ;;  %s4614_s3 = sld [smem:[#allocation10_spill]] (!%p565_p2)  ;;  %s4615_s1 = sld [smem:[#allocation8_spill]] (!%p565_p2) }
   0xd   : > { %634 = vst.msk [vmem:[#allocation2] sm:$0x1] (!%p565_p2), %vm633_vm2, %v3714_v5  ;;  %635 = vst.msk [vmem:[#allocation2 + $0x11] sm:$0x1] (!%p565_p2), %vm633_vm2, %v3714_v5  ;;  %s4616_s25 = sld [smem:[#allocation9_spill]] (!%p565_p2)  ;;  %vm1669_vm6 = vcmask (!%p565_p2), 1041408  }
   0xe   : > { %vm1665_vm7 = vcmask (!%p565_p2), 15360   ;;  %vm2185_vm8 = vcmask (!%p565_p2), 64512   ;;  %vm2188_vm9 = vcmask (!%p565_p2), 392512   ;;  %vm2182_vm10 = vcmask (!%p565_p2), 388096  }
   0xf   : > { %2186 = vst.msk [vmem:[#allocation3 + $0x4] sm:$0xff] (!%p565_p2), %vm2185_vm8, %v3714_v5  ;;  %2187 = vst.msk [vmem:[#allocation3 + $0xc] sm:$0xff] (!%p565_p2), %vm2185_vm8, %v3714_v5  ;;  %vm3718_vm11 = vmmov (!%p565_p2), 0   ;;  %vm2199_vm12 = vcmask (!%p565_p2), 326720   ;;  %vm2239_vm13 = vcmask (!%p565_p2), 392192   ;;  %vm2746_vm14 = vcmask (!%p565_p2), 261120  }
  0x10   : > { %v3528_v1 = vld [vmem:[%s4612_s19 + $0x94] ss:$16 sps:$4 sm:$0xff] (!%p565_p2)   ;;  %v3530_v2 = vld [vmem:[%s4612_s19 + $0x9c] ss:$16 sps:$4 sm:$0xff] (!%p565_p2)   ;;  %v3532_v3 = vld [vmem:[%s4612_s19 + $0x90] ss:$16 sps:$4 sm:$0xff] (!%p565_p2)  }
  0x11   : > { %805 = vmatprep.subr.bf16.mxu0 (!%p565_p2), %v3528_v1  ;;  %v3533_v4 = vld [vmem:[%s4612_s19 + $0x98] ss:$16 sps:$4 sm:$0xff] (!%p565_p2)   ;;  %848 = vmatprep.subr.bf16.mxu1 (!%p565_p2), %v3530_v2  ;;  %v3534_v6 = vld [vmem:[%s4612_s19 + $0xb4] ss:$16 sps:$4 sm:$0xff] (!%p565_p2)   ;;  %v3536_v7 = vld [vmem:[%s4612_s19 + $0xbc] ss:$16 sps:$4 sm:$0xff] (!%p565_p2)  }
  0x12   : > { %s4618_s24 = smov (!%p622_p3, %s2995_s24), 1  ;;  %806 = vmatpush1.bf16.msra.mxu0 %v3532_v3  ;;  %849 = vmatpush1.bf16.msra.mxu1 %v3533_v4  ;;  %v3012_v8 = vld [vmem:[%s4612_s19 + $0xd0] sm:$0xff]  ;;  %v3539_v10 = vld [vmem:[%s4612_s19 + $0xb8] ss:$16 sps:$4 sm:$0xff]   ;;  %v3014_v11 = vld [vmem:[%s4612_s19 + $0xe0] sm:$0xff]  ;;  %2189 = vst.msk [vmem:[#allocation3 + $0x4] sm:$0xff] %vm2188_vm9, %v3714_v5 }
  0x13   : > { %s3217_s21 = sshll.u32 %s4618_s24, 4  ;;  %807 = vmatprep.subr.bf16.mxu0 %v3534_v6  ;;  %v3538_v9 = vld [vmem:[%s4612_s19 + $0xb0] ss:$16 sps:$4 sm:$0xff]   ;;  %850 = vmatprep.subr.bf16.mxu1 %v3536_v7  ;;  %v3540_v14 = vld [vmem:[%s4612_s19 + $0xd4] ss:$16 sps:$4 sm:$0xff]   ;;  %v3030_v17 = vcombine.low %v3012_v8, %v3014_v11  ;;  %v3021_v22 = vld [vmem:[%s4612_s19 + $0x118] sm:$0xff] }
  0x14   : > { %s626_s28 = scalar_lea.vmem %s4613_s27, %s3217_s21  ;;  %s3715_s21 = smov 4   ;;  %v3542_v15 = vld [vmem:[%s4612_s19 + $0xdc] ss:$16 sps:$4 sm:$0xff]   ;;  %v3544_v18 = vld [vmem:[%s4612_s19 + $0xd8] ss:$16 sps:$4 sm:$0xff]   ;;  %v3020_v21 = vld [vmem:[%s4612_s19 + $0x110] sm:$0xff]  ;;  %v3041_v26 = vcombine.high %v3021_v22, %v3021_v22  ;;  %v3040_v28 = vcombine.low %v3021_v22, %v3021_v22 }
  0x15   : > { %v642_v12 = vld [vmem:[%s626_s28] sm:$0xff]  ;;  %v643_v13 = vld [vmem:[%s626_s28 + $0x8] sm:$0xff]  ;;  %v3039_v25 = vcombine.high %v3020_v21, %v3020_v21  ;;  %v3038_v27 = vcombine.low %v3020_v21, %v3020_v21  ;;  %2190 = vst.msk [vmem:[#allocation3 + $0xc] sm:$0xff] %vm2188_vm9, %v3714_v5  ;;  %s3218_s30 = sshll.u32 %s4618_s24, 6 }
  0x16   : > { %646 = vrot.lane.b32.xlu0 %v642_v12, %s3715_s21  ;;  %808 = vmatpush1.bf16.msra.mxu0 %v3538_v9  ;;  %v3545_v19 = vld [vmem:[%s4612_s19 + $0xf4] ss:$16 sps:$4 sm:$0xff]   ;;  %v3547_v20 = vld [vmem:[%s4612_s19 + $0xfc] ss:$16 sps:$4 sm:$0xff]   ;;  %v3549_v23 = vld [vmem:[%s4612_s19 + $0xf0] ss:$16 sps:$4 sm:$0xff]   ;;  %s631_s2 = scalar_lea.vmem %s4604_s20, %s3218_s30 }
  0x17   : > { %851 = vmatpush1.bf16.msra.mxu1 %v3539_v10  ;;  %809 = vmatprep.subr.bf16.mxu0 %v3540_v14  ;;  %v3550_v24 = vld [vmem:[%s4612_s19 + $0xf8] ss:$16 sps:$4 sm:$0xff]   ;;  %v3557_v29 = vld [vmem:[%s4612_s19 + $0x4] ss:$16 sps:$4 sm:$0xff]   ;;  %v794_v30 = vsel %vm792_vm3, %v3038_v27, 0  ;;  %v800_v31 = vsel %vm792_vm3, %v3040_v28, 0 }
  0x18   : > { %852 = vmatprep.subr.bf16.mxu1 %v3542_v15  ;;  %v3560_v32 = vld [vmem:[%s4612_s19 + $0xc] ss:$16 sps:$4 sm:$0xff]   ;;  %v3555_v35 = vld [vmem:[%s4612_s19] ss:$16 sps:$4 sm:$0xff]   ;;  %v3558_v36 = vld [vmem:[%s4612_s19 + $0x8] ss:$16 sps:$4 sm:$0xff]  }
  0x19   : > { %v3563_v40 = vld [vmem:[%s4612_s19 + $0x24] ss:$16 sps:$4 sm:$0xff]   ;;  %v3566_v41 = vld [vmem:[%s4612_s19 + $0x2c] ss:$16 sps:$4 sm:$0xff]   ;;  %v3561_v42 = vld [vmem:[%s4612_s19 + $0x20] ss:$16 sps:$4 sm:$0xff]  }
  0x1a   : > { %648 = vrot.lane.b32.xlu0 %v643_v13, %s3715_s21  ;;  %810 = vmatpush1.bf16.msra.mxu0 %v3030_v17  ;;  %v3564_v43 = vld [vmem:[%s4612_s19 + $0x28] ss:$16 sps:$4 sm:$0xff]   ;;  %v3569_v44 = vld [vmem:[%s4612_s19 + $0x44] ss:$16 sps:$4 sm:$0xff]   ;;  %v3572_v45 = vld [vmem:[%s4612_s19 + $0x4c] ss:$16 sps:$4 sm:$0xff]  }
  0x1b   : > { %853 = vmatpush1.bf16.msra.mxu1 %v3544_v18  ;;  %811 = vmatprep.subr.bf16.mxu0 %v3545_v19  ;;  %v3567_v46 = vld [vmem:[%s4612_s19 + $0x40] ss:$16 sps:$4 sm:$0xff]   ;;  %v3570_v47 = vld [vmem:[%s4612_s19 + $0x48] ss:$16 sps:$4 sm:$0xff]   ;;  %v3575_v48 = vld [vmem:[%s4612_s19 + $0x64] ss:$16 sps:$4 sm:$0xff]  }
  0x1c   : > { %854 = vmatprep.subr.bf16.mxu1 %v3547_v20  ;;  %v3578_v49 = vld [vmem:[%s4612_s19 + $0x6c] ss:$16 sps:$4 sm:$0xff]   ;;  %v674_v50 = vld [vmem:[%s4612_s19 + $0x80] sm:$0xff]  ;;  %v3576_v53 = vld [vmem:[%s4612_s19 + $0x68] ss:$16 sps:$4 sm:$0xff]  }
  0x1d   : > { %v675_v51 = vld [vmem:[%s4612_s19 + $0x88] sm:$0xff]  ;;  %v3573_v52 = vld [vmem:[%s4612_s19 + $0x60] ss:$16 sps:$4 sm:$0xff]   ;;  %v3063_v54 = vcombine.high %v674_v50, %v674_v50  ;;  %v3062_v56 = vcombine.low %v674_v50, %v674_v50  ;;  %v3585_v60 = vld [vmem:[%s4612_s19 + $0x124] ss:$16 sps:$4 sm:$0xff]  }
  0x1e   : > { %812 = vmatpush1.bf16.msra.mxu0 %v3549_v23  ;;  %v3065_v55 = vcombine.high %v675_v51, %v675_v51  ;;  %v3064_v57 = vcombine.low %v675_v51, %v675_v51  ;;  %v3588_v61 = vld [vmem:[%s4612_s19 + $0x12c] ss:$16 sps:$4 sm:$0xff]   ;;  %v3583_v0 = vld [vmem:[%s4612_s19 + $0x120] ss:$16 sps:$4 sm:$0xff]   ;;  %v3586_v1 = vld [vmem:[%s4612_s19 + $0x128] ss:$16 sps:$4 sm:$0xff]  }
  0x1f   : > { %855 = vmatpush1.bf16.msra.mxu1 %v3550_v24  ;;  %3042 = vmatprep.subr.msk.bf16.mxu0 %vm792_vm3, %v3039_v25  ;;  %v985_v58 = vsel %vm792_vm3, %v3062_v56, 0  ;;  %v3591_v3 = vld [vmem:[%s4612_s19 + $0x144] ss:$16 sps:$4 sm:$0xff]   ;;  %v3594_v4 = vld [vmem:[%s4612_s19 + $0x14c] ss:$16 sps:$4 sm:$0xff]  }
  0x20   : > { %3044 = vmatprep.subr.msk.bf16.mxu1 %vm792_vm3, %v3041_v26  ;;  %v991_v59 = vsel %vm792_vm3, %v3064_v57, 0  ;;  %v3589_v6 = vld [vmem:[%s4612_s19 + $0x140] ss:$16 sps:$4 sm:$0xff]   ;;  %v3592_v7 = vld [vmem:[%s4612_s19 + $0x148] ss:$16 sps:$4 sm:$0xff]  }
  0x21   : > { %v3597_v8 = vld [vmem:[%s4612_s19 + $0x164] ss:$16 sps:$4 sm:$0xff]   ;;  %v3600_v9 = vld [vmem:[%s4612_s19 + $0x16c] ss:$16 sps:$4 sm:$0xff]   ;;  %v3595_v10 = vld [vmem:[%s4612_s19 + $0x160] ss:$16 sps:$4 sm:$0xff]  }
  0x22   : > { %814 = vmatpush1.bf16.msra.mxu0 %v794_v30  ;;  %v3598_v11 = vld [vmem:[%s4612_s19 + $0x168] ss:$16 sps:$4 sm:$0xff]   ;;  %v3603_v12 = vld [vmem:[%s4612_s19 + $0x184] ss:$16 sps:$4 sm:$0xff]   ;;  %v3606_v13 = vld [vmem:[%s4612_s19 + $0x18c] ss:$16 sps:$4 sm:$0xff]  }
  0x23   : > { %857 = vmatpush1.bf16.msra.mxu1 %v800_v31  ;;  %996 = vmatprep.subr.bf16.mxu0 %v3557_v29  ;;  %v3086_v14 = vld [vmem:[%s4612_s19 + $0x1a0] sm:$0xff]  ;;  %v3087_v15 = vld [vmem:[%s4612_s19 + $0x1a8] sm:$0xff]  ;;  %2183 = vst.msk [vmem:[#allocation3] sm:$0xf] %vm2182_vm10, %v3714_v5  ;;  %2184 = vst.msk [vmem:[#allocation3 + $0x14] sm:$0xf] %vm2182_vm10, %v3714_v5 }
  0x24   : > { %1039 = vmatprep.subr.bf16.mxu1 %v3560_v32  ;;  %v3601_v17 = vld [vmem:[%s4612_s19 + $0x180] ss:$16 sps:$4 sm:$0xff]   ;;  %v3604_v18 = vld [vmem:[%s4612_s19 + $0x188] ss:$16 sps:$4 sm:$0xff]   ;;  %v3105_v19 = vcombine.high %v3086_v14, %v3086_v14  ;;  %v3107_v20 = vcombine.high %v3087_v15, %v3087_v15  ;;  %v3104_v21 = vcombine.low %v3086_v14, %v3086_v14  ;;  %v3106_v22 = vcombine.low %v3087_v15, %v3087_v15 }
  0x25   : > { %v1431_v23 = vld [vmem:[%s4614_s3 + $0x80] sm:$0xff]  ;;  %v1432_v24 = vld [vmem:[%s4614_s3 + $0x88] sm:$0xff] }
  0x26   : > { %v1463_v25 = vld [vmem:[%s4614_s3 + $0x180] sm:$0xff]  ;;  %v1464_v26 = vld [vmem:[%s4614_s3 + $0x188] sm:$0xff]  ;;  %v1198_v31 = vsel %vm792_vm3, %v3104_v21, 0  ;;  %v1204_v32 = vsel %vm792_vm3, %v3106_v22, 0 }
  0x27   : > { %v1415_v27 = vld [vmem:[%s4614_s3] sm:$0xff]  ;;  %v1416_v28 = vld [vmem:[%s4614_s3 + $0x8] sm:$0xff] }
  0x28   : > { %v1447_v29 = vld [vmem:[%s4614_s3 + $0x100] sm:$0xff]  ;;  %v1448_v30 = vld [vmem:[%s4614_s3 + $0x108] sm:$0xff] }
  0x29   : > { %v1468_v56 = vld [vmem:[%s4614_s3 + $0x1a8] sm:$0xff]  ;;  %v1419_v57 = vld [vmem:[%s4614_s3 + $0x20] sm:$0xff] }
  0x2a   : > { %v1440_v14 = vld [vmem:[%s4614_s3 + $0xc8] sm:$0xff]  ;;  %v1471_v15 = vld [vmem:[%s4614_s3 + $0x1c0] sm:$0xff] }
  0x88   : > { %v647_v33 = vpop.permute.xlu0 %646 }
  0x89   : > { %653 = vst.msk [vmem:[#allocation2 + $0x1] sm:$0xff] %vm652_vm4, %v647_v33  ;;  %v3417_v33 = vpack.c.bf16 %v1432_v24, %v1431_v23  ;;  %v1455_v23 = vld [vmem:[%s4614_s3 + $0x140] sm:$0xff]  ;;  %v1456_v24 = vld [vmem:[%s4614_s3 + $0x148] sm:$0xff] }
  0x8c   : > { %v649_v34 = vpop.permute.xlu0 %648 }
  0x8d   : > { %654 = vst.msk [vmem:[#allocation2 + $0x9] sm:$0xff] %vm652_vm4, %v649_v34  ;;  %v3449_v34 = vpack.c.bf16 %v1464_v26, %v1463_v25  ;;  %v3467_v25 = vpack.c.bf16 %v1456_v24, %v1455_v23  ;;  %v1441_v26 = vld [vmem:[%s4614_s3 + $0xd0] sm:$0xff] }
  0x90   : > { %v676_v37 = vld [vmem:[#allocation2 + $0x1] sm:$0xff] }
  0x91   : > { %v655_v63 = vld [vmem:[#allocation2] sm:$0xff] }
  0x94   : > { %v677_v38 = vld [vmem:[#allocation2 + $0x9] sm:$0xff] }
  0x95   : > { %v678_v39 = vpack.c.bf16 %v677_v38, %v676_v37  ;;  %v656_v62 = vld [vmem:[#allocation2 + $0x8] sm:$0xff]  ;;  %v1465_v37 = vld [vmem:[%s4614_s3 + $0x190] sm:$0xff] }
  0x96   : > { %v657_v2 = vpack.c.bf16 %v656_v62, %v655_v63  ;;  %v1082_v38 = vld [vmem:[#allocation2 + $0x2] sm:$0xff] }
  0x97   : > { %3043 = vmatmul.mubr.msk.bf16.vlgmr.msra.gmra.mrb[0].mxu0 %vm788_vm5, %v678_v39  ;;  %3045 = vmatmul.mubr.msk.bf16.vlgmr.msra.gmra.mrb[0].mxu1 %vm788_vm5, %v678_v39  ;;  %v1083_v39 = vld [vmem:[#allocation2 + $0xa] sm:$0xff] }
  0x98   : > { %997 = vmatpush1.bf16.msra.mxu0 %v3555_v35  ;;  %1040 = vmatpush1.bf16.msra.mxu1 %v3558_v36  ;;  %v1433_v35 = vld [vmem:[%s4614_s3 + $0x90] sm:$0xff]  ;;  %v1434_v36 = vld [vmem:[%s4614_s3 + $0x98] sm:$0xff]  ;;  %v1452_v62 = vld [vmem:[%s4614_s3 + $0x128] sm:$0xff] }
  0x99   : > { %998 = vmatprep.subr.bf16.mxu0 %v3563_v40  ;;  %1041 = vmatprep.subr.bf16.mxu1 %v3566_v41  ;;  %v1466_v40 = vld [vmem:[%s4614_s3 + $0x198] sm:$0xff]  ;;  %v3419_v41 = vpack.c.bf16 %v1416_v28, %v1415_v27  ;;  %v1473_v28 = vld [vmem:[%s4614_s3 + $0x1d0] sm:$0xff] }
  0x9a   : > { %1028 = vmatprep.mubr.bf16.mxu0 %v3716_v16  ;;  %1071 = vmatprep.mubr.bf16.mxu1 %v3716_v16  ;;  %v1442_v27 = vld [vmem:[%s4614_s3 + $0xd8] sm:$0xff] }
  0x9c   : > { %999 = vmatpush1.bf16.msra.mxu0 %v3561_v42  ;;  %1042 = vmatpush1.bf16.msra.mxu1 %v3564_v43  ;;  %v3451_v42 = vpack.c.bf16 %v1448_v30, %v1447_v29  ;;  %v1417_v43 = vld [vmem:[%s4614_s3 + $0x10] sm:$0xff]  ;;  %v3437_v29 = vpack.c.bf16 %v1442_v27, %v1441_v26  ;;  %v1474_v30 = vld [vmem:[%s4614_s3 + $0x1d8] sm:$0xff] }
  0x9d   : > { %1000 = vmatprep.subr.bf16.mxu0 %v3569_v44  ;;  %1043 = vmatprep.subr.bf16.mxu1 %v3572_v45  ;;  %v1084_v44 = vpack.c.bf16 %v1083_v39, %v1082_v38  ;;  %v3421_v45 = vpack.c.bf16 %v1434_v36, %v1433_v35  ;;  %v1457_v35 = vld [vmem:[%s4614_s3 + $0x150] sm:$0xff]  ;;  %v1458_v36 = vld [vmem:[%s4614_s3 + $0x158] sm:$0xff]  ;;  %v1443_v38 = vld [vmem:[%s4614_s3 + $0xe0] sm:$0xff] }
  0x9e   : > { %v1444_v39 = vld [vmem:[%s4614_s3 + $0xe8] sm:$0xff] }
  0xa0   : > { %1001 = vmatpush1.bf16.msra.mxu0 %v3567_v46  ;;  %1044 = vmatpush1.bf16.msra.mxu1 %v3570_v47  ;;  %v3453_v46 = vpack.c.bf16 %v1466_v40, %v1465_v37  ;;  %v1418_v47 = vld [vmem:[%s4614_s3 + $0x18] sm:$0xff]  ;;  %v3471_v37 = vpack.c.bf16 %v1458_v36, %v1457_v35  ;;  %v1475_v40 = vld [vmem:[%s4614_s3 + $0x1e0] sm:$0xff] }
  0xa1   : > { %1002 = vmatprep.subr.bf16.mxu0 %v3575_v48  ;;  %1045 = vmatprep.subr.bf16.mxu1 %v3578_v49  ;;  %v1449_v48 = vld [vmem:[%s4614_s3 + $0x110] sm:$0xff]  ;;  %v1450_v49 = vld [vmem:[%s4614_s3 + $0x118] sm:$0xff]  ;;  %v3423_v50 = vpack.c.bf16 %v1418_v47, %v1417_v43  ;;  %v1427_v43 = vld [vmem:[%s4614_s3 + $0x60] sm:$0xff] }
  0xa2   : > { %v3455_v51 = vpack.c.bf16 %v1450_v49, %v1449_v48  ;;  %v1459_v47 = vld [vmem:[%s4614_s3 + $0x160] sm:$0xff]  ;;  %v1460_v48 = vld [vmem:[%s4614_s3 + $0x168] sm:$0xff]  ;;  %v1445_v49 = vld [vmem:[%s4614_s3 + $0xf0] sm:$0xff] }
  0xa4   : > { %1003 = vmatpush1.bf16.msra.mxu0 %v3573_v52  ;;  %1046 = vmatpush1.bf16.msra.mxu1 %v3576_v53  ;;  %v1435_v52 = vld [vmem:[%s4614_s3 + $0xa0] sm:$0xff]  ;;  %v1436_v53 = vld [vmem:[%s4614_s3 + $0xa8] sm:$0xff] }
  0xa5   : > { %3066 = vmatprep.subr.msk.bf16.mxu0 %vm792_vm3, %v3063_v54  ;;  %3068 = vmatprep.subr.msk.bf16.mxu1 %vm792_vm3, %v3065_v55  ;;  %v3425_v54 = vpack.c.bf16 %v1436_v53, %v1435_v52  ;;  %v1467_v55 = vld [vmem:[%s4614_s3 + $0x1a0] sm:$0xff]  ;;  %v1477_v52 = vld [vmem:[%s4614_s3 + $0x1f0] sm:$0xff]  ;;  %v1478_v53 = vld [vmem:[%s4614_s3 + $0x1f8] sm:$0xff] }
  0xa8   : > { %1005 = vmatpush1.bf16.msra.mxu0 %v985_v58  ;;  %1048 = vmatpush1.bf16.msra.mxu1 %v991_v59  ;;  %v3457_v58 = vpack.c.bf16 %v1468_v56, %v1467_v55  ;;  %v1420_v59 = vld [vmem:[%s4614_s3 + $0x28] sm:$0xff]  ;;  %v3477_v55 = vpack.c.bf16 %v1478_v53, %v1477_v52  ;;  %v1429_v56 = vld [vmem:[%s4614_s3 + $0x70] sm:$0xff] }
  0xa9   : > { %1209 = vmatprep.subr.bf16.mxu0 %v3585_v60  ;;  %1252 = vmatprep.subr.bf16.mxu1 %v3588_v61  ;;  %v1451_v60 = vld [vmem:[%s4614_s3 + $0x120] sm:$0xff]  ;;  %v3427_v61 = vpack.c.bf16 %v1420_v59, %v1419_v57  ;;  %v1430_v57 = vld [vmem:[%s4614_s3 + $0x78] sm:$0xff] }
  0xaa   : > { %v3459_v63 = vpack.c.bf16 %v1452_v62, %v1451_v60  ;;  %v1462_v59 = vld [vmem:[%s4614_s3 + $0x178] sm:$0xff]  ;;  %v3447_v60 = vpack.c.bf16 %v1430_v57, %v1429_v56  ;;  %v1305_v62 = vlaneseq }
  0xab   : > { %3067 = vmatmul.mubr.msk.bf16.vlgmr.msra.gmra.mrb[0].mxu0 %vm788_vm5, %v657_v2  ;;  %3069 = vmatmul.mubr.msk.bf16.vlgmr.msra.gmra.mrb[0].mxu1 %vm788_vm5, %v657_v2  ;;  %v1469_v2 = vld [vmem:[%s4614_s3 + $0x1b0] sm:$0xff] }
  0xac   : > { %1210 = vmatpush1.bf16.msra.mxu0 %v3583_v0  ;;  %1253 = vmatpush1.bf16.msra.mxu1 %v3586_v1  ;;  %v1437_v0 = vld [vmem:[%s4614_s3 + $0xb0] sm:$0xff]  ;;  %v1438_v1 = vld [vmem:[%s4614_s3 + $0xb8] sm:$0xff] }
  0xad   : > { %1211 = vmatprep.subr.bf16.mxu0 %v3591_v3  ;;  %1254 = vmatprep.subr.bf16.mxu1 %v3594_v4  ;;  %v3429_v3 = vpack.c.bf16 %v1438_v1, %v1437_v0  ;;  %v1470_v4 = vld [vmem:[%s4614_s3 + $0x1b8] sm:$0xff] }
  0xae   : > { %1241 = vmatprep.mubr.bf16.mxu0 %v3716_v16  ;;  %1284 = vmatprep.mubr.bf16.mxu1 %v3716_v16 }
  0xb0   : > { %1212 = vmatpush1.bf16.msra.mxu0 %v3589_v6  ;;  %1255 = vmatpush1.bf16.msra.mxu1 %v3592_v7  ;;  %v1421_v6 = vld [vmem:[%s4614_s3 + $0x30] sm:$0xff]  ;;  %v1422_v7 = vld [vmem:[%s4614_s3 + $0x38] sm:$0xff] }
  0xb1   : > { %1213 = vmatprep.subr.bf16.mxu0 %v3597_v8  ;;  %1256 = vmatprep.subr.bf16.mxu1 %v3600_v9  ;;  %v3461_v8 = vpack.c.bf16 %v1470_v4, %v1469_v2  ;;  %v3431_v9 = vpack.c.bf16 %v1422_v7, %v1421_v6  ;;  %v1303_v2 = vld [vmem:[%s4615_s1] sm:$0xf]  ;;  %s3719_s1 = smov 8  }
  0xb2   : > { %v1333_v6 = vld [vmem:[%s4616_s25] sm:$0xf] }
  0xb4   : > { %1214 = vmatpush1.bf16.msra.mxu0 %v3595_v10  ;;  %1257 = vmatpush1.bf16.msra.mxu1 %v3598_v11  ;;  %v1453_v10 = vld [vmem:[%s4614_s3 + $0x130] sm:$0xff]  ;;  %v1454_v11 = vld [vmem:[%s4614_s3 + $0x138] sm:$0xff] }
  0xb5   : > { %1215 = vmatprep.subr.bf16.mxu0 %v3603_v12  ;;  %1258 = vmatprep.subr.bf16.mxu1 %v3606_v13  ;;  %v3463_v12 = vpack.c.bf16 %v1454_v11, %v1453_v10  ;;  %v1439_v13 = vld [vmem:[%s4614_s3 + $0xc0] sm:$0xff] }
  0xb8   : > { %1216 = vmatpush1.bf16.msra.mxu0 %v3601_v17  ;;  %1259 = vmatpush1.bf16.msra.mxu1 %v3604_v18  ;;  %v3433_v17 = vpack.c.bf16 %v1440_v14, %v1439_v13  ;;  %v1472_v18 = vld [vmem:[%s4614_s3 + $0x1c8] sm:$0xff] }
  0xb9   : > { %3108 = vmatprep.subr.msk.bf16.mxu0 %vm792_vm3, %v3105_v19  ;;  %3110 = vmatprep.subr.msk.bf16.mxu1 %vm792_vm3, %v3107_v20  ;;  %v1423_v19 = vld [vmem:[%s4614_s3 + $0x40] sm:$0xff]  ;;  %v1424_v20 = vld [vmem:[%s4614_s3 + $0x48] sm:$0xff]  ;;  %v3465_v21 = vpack.c.bf16 %v1472_v18, %v1471_v15 }
  0xba   : > { %v3435_v22 = vpack.c.bf16 %v1424_v20, %v1423_v19 }
  0xbc   : > { %1218 = vmatpush1.bf16.msra.mxu0 %v1198_v31  ;;  %1261 = vmatpush1.bf16.msra.mxu1 %v1204_v32  ;;  %v1425_v31 = vld [vmem:[%s4614_s3 + $0x50] sm:$0xff]  ;;  %v1426_v32 = vld [vmem:[%s4614_s3 + $0x58] sm:$0xff] }
  0xbd   : > { %3418 = vmatprep.subr.bf16.mxu0 %v3417_v33  ;;  %3450 = vmatprep.subr.bf16.mxu1 %v3449_v34  ;;  %v3469_v33 = vpack.c.bf16 %v1474_v30, %v1473_v28  ;;  %v3439_v34 = vpack.c.bf16 %v1426_v32, %v1425_v31 }
  0xbf   : > { %3109 = vmatmul.mubr.msk.bf16.vlgmr.msra.gmra.mrb[0].mxu0 %vm788_vm5, %v1084_v44  ;;  %3111 = vmatmul.mubr.msk.bf16.vlgmr.msra.gmra.mrb[0].mxu1 %vm788_vm5, %v1084_v44  ;;  %v1428_v44 = vld [vmem:[%s4614_s3 + $0x68] sm:$0xff] }
  0xc0   : > { %3420 = vmatpush3.bf16.msra.mxu0 %v3419_v41  ;;  %3452 = vmatpush3.bf16.msra.mxu1 %v3451_v42  ;;  %v3441_v41 = vpack.c.bf16 %v1444_v39, %v1443_v38  ;;  %v1476_v42 = vld [vmem:[%s4614_s3 + $0x1e8] sm:$0xff] }
  0xc1   : > { %3422 = vmatprep.subr.bf16.mxu0 %v3421_v45  ;;  %3454 = vmatprep.subr.bf16.mxu1 %v3453_v46  ;;  %v3473_v45 = vpack.c.bf16 %v1476_v42, %v1475_v40  ;;  %v3443_v46 = vpack.c.bf16 %v1428_v44, %v1427_v43 }
  0xc4   : > { %3424 = vmatpush3.bf16.msra.mxu0 %v3423_v50  ;;  %3456 = vmatpush3.bf16.msra.mxu1 %v3455_v51  ;;  %v3475_v50 = vpack.c.bf16 %v1460_v48, %v1459_v47  ;;  %v1446_v51 = vld [vmem:[%s4614_s3 + $0xf8] sm:$0xff] }
  0xc5   : > { %3426 = vmatprep.subr.bf16.mxu0 %v3425_v54  ;;  %3458 = vmatprep.subr.bf16.mxu1 %v3457_v58  ;;  %v3445_v54 = vpack.c.bf16 %v1446_v51, %v1445_v49  ;;  %v1461_v58 = vld [vmem:[%s4614_s3 + $0x170] sm:$0xff] }
  0xc8   : > { %3428 = vmatpush3.bf16.msra.mxu0 %v3427_v61  ;;  %3460 = vmatpush3.bf16.msra.mxu1 %v3459_v63  ;;  %v3479_v61 = vpack.c.bf16 %v1462_v59, %v1461_v58  ;;  %v4230_v63 = vshrl.u32 %v1305_v62, 7 }
  0xc9   : > { %3430 = vmatprep.subr.bf16.mxu0 %v3429_v3  ;;  %3462 = vmatprep.subr.bf16.mxu1 %v3461_v8 }
  0xca   : > { %v4233_v0 = vsub.s32 0, %v4230_v63  ;;  %v4236_v1 = vsub.s32 2, %v4230_v63  ;;  %v4242_v3 = vsub.s32 1, %v4230_v63  ;;  %v4245_v4 = vsub.s32 3, %v4230_v63 }
  0xcc   : > { %3432 = vmatpush3.bf16.msra.mxu0 %v3431_v9  ;;  %3464 = vmatpush3.bf16.msra.mxu1 %v3463_v12  ;;  %v1308_v7 = vrot.slane %v1303_v2, %v4233_v0  ;;  %v1316_v8 = vrot.slane %v1303_v2, %v4236_v1  ;;  %v1312_v9 = vrot.slane %v1303_v2, %v4242_v3 }
  0xcd   : > { %3434 = vmatprep.subr.bf16.mxu0 %v3433_v17  ;;  %3466 = vmatprep.subr.bf16.mxu1 %v3465_v21  ;;  %v1320_v10 = vrot.slane %v1303_v2, %v4245_v4  ;;  %v1338_v11 = vrot.slane %v1333_v6, %v4233_v0  ;;  %v1346_v12 = vrot.slane %v1333_v6, %v4236_v1 }
  0xce   : > { %v1342_v15 = vrot.slane %v1333_v6, %v4242_v3  ;;  %v1350_v17 = vrot.slane %v1333_v6, %v4245_v4 }
  0xd0   : > { %3436 = vmatpush3.bf16.msra.mxu0 %v3435_v22  ;;  %3468 = vmatpush3.bf16.msra.mxu1 %v3467_v25 }
  0xd1   : > { %3438 = vmatprep.subr.bf16.mxu0 %v3437_v29  ;;  %3470 = vmatprep.subr.bf16.mxu1 %v3469_v33 }
  0xd4   : > { %3440 = vmatpush3.bf16.msra.mxu0 %v3439_v34  ;;  %3472 = vmatpush3.bf16.msra.mxu1 %v3471_v37 }
  0xd5   : > { %3442 = vmatprep.subr.bf16.mxu0 %v3441_v41  ;;  %3474 = vmatprep.subr.bf16.mxu1 %v3473_v45 }
  0xd8   : > { %3444 = vmatpush3.bf16.msra.mxu0 %v3443_v46  ;;  %3476 = vmatpush3.bf16.msra.mxu1 %v3475_v50 }
  0xd9   : > { %3446 = vmatprep.subr.bf16.mxu0 %v3445_v54  ;;  %3478 = vmatprep.subr.bf16.mxu1 %v3477_v55 }
  0xdc   : > { %3448 = vmatpush3.bf16.msra.mxu0 %v3447_v60  ;;  %3480 = vmatpush3.bf16.msra.mxu1 %v3479_v61 }
 0x192   : > { %v1243_v13 = vpop.f32.mrb[0].mxu0  ;;  %v1286_v14 = vpop.f32.mrb[0].mxu1 }
 0x193   : > { %v1325_v18 = vmul.f32 %v1308_v7, %v1243_v13  ;;  %v1327_v19 = vmul.f32 %v1316_v8, %v1286_v14  ;;  %v1245_v20 = vpop.f32.mrb[1].mxu0  ;;  %v1288_v21 = vpop.f32.mrb[1].mxu1 }
 0x194   : > { %v1326_v22 = vmul.f32 %v1312_v9, %v1245_v20  ;;  %v1328_v23 = vmul.f32 %v1320_v10, %v1288_v21  ;;  %v1247_v24 = vpop.f32.mrb[2].mxu0  ;;  %v1290_v25 = vpop.f32.mrb[2].mxu1 }
 0x195   : > { %v1355_v26 = vadd.f32 %v1338_v11, %v1325_v18  ;;  %v1357_v27 = vadd.f32 %v1346_v12, %v1327_v19  ;;  %v1329_v28 = vmul.f32 %v1308_v7, %v1247_v24  ;;  %v1331_v29 = vmul.f32 %v1316_v8, %v1290_v25  ;;  %v1249_v30 = vpop.f32.mrb[3].mxu0  ;;  %v1292_v31 = vpop.f32.mrb[3].mxu1 }
 0x196   : > { %v1356_v32 = vadd.f32 %v1342_v15, %v1326_v22  ;;  %v1358_v33 = vadd.f32 %v1350_v17, %v1328_v23  ;;  %v1330_v34 = vmul.f32 %v1312_v9, %v1249_v30  ;;  %v1332_v35 = vmul.f32 %v1320_v10, %v1292_v31  ;;  %v1624_v22 = vld [vmem:[%s4591_s7] sm:$0xff] }
 0x197   : > { %v1359_v36 = vadd.f32 %v1338_v11, %v1329_v28  ;;  %v1361_v37 = vadd.f32 %v1346_v12, %v1331_v29  ;;  %v4258_v40 = vmax.f32 %v1355_v26, 0.0  ;;  %v4260_v41 = vmax.f32 %v1357_v27, 0.0  ;;  %v3612_v29 = vld [vmem:[%s4593_s9 + $0x40] sm:$0xff]  }
 0x198   : > { %v1360_v38 = vadd.f32 %v1342_v15, %v1330_v34  ;;  %v1362_v39 = vadd.f32 %v1350_v17, %v1332_v35  ;;  %v4266_v44 = vmax.f32 %v1356_v32, 0.0  ;;  %v4268_v45 = vmax.f32 %v1358_v33, 0.0  ;;  %v3613_v30 = vld [vmem:[%s4593_s9 + $0xc0] sm:$0xff]  }
 0x199   : > { %v4262_v42 = vmax.f32 %v1359_v36, 0.0  ;;  %v4264_v43 = vmax.f32 %v1361_v37, 0.0  ;;  %v3717_v19 = vmov 1983009808   ;;  %v1627_v24 = vcombine.high %v1624_v22, %v1624_v22  ;;  %v1619_v36 = vld [vmem:[%s4589_s5] sm:$0x1] }
 0x19a   : > { %v4270_v46 = vmax.f32 %v1360_v38, 0.0  ;;  %v4272_v47 = vmax.f32 %v1362_v39, 0.0  ;;  %v1629_v20 = vunpack.c.l.s4 %v3717_v19  ;;  %v1621_v38 = vld [vmem:[%s4590_s6] sm:$0x1]  ;;  %v3638_v19 = vld [vmem:[%s4593_s9 + $0x30] sm:$0xff]  }
 0x19b   : > { %v1387_v48 = vadd.f32 %v4262_v42, %v4258_v40  ;;  %v1401_v49 = vadd.f32 %v4264_v43, %v4260_v41 }
 0x19c   : > { %v1394_v50 = vadd.f32 %v4270_v46, %v4266_v44  ;;  %v1408_v51 = vadd.f32 %v4272_v47, %v4268_v45  ;;  %v1630_v21 = vunpack.c.0.s8 %v1629_v20  ;;  %v3639_v20 = vld [vmem:[%s4593_s9 + $0xb0] sm:$0xff]  }
 0x19d   : > { %v1388_v52 = vrot.slane %v1387_v48, 4  ;;  %v1402_v53 = vrot.slane %v1401_v49, 4 }
 0x19e   : > { %v1395_v54 = vrot.slane %v1394_v50, 4  ;;  %v1409_v55 = vrot.slane %v1408_v51, 4  ;;  %v1633_v23 = vsub.s32 %v1630_v21, %v4230_v63  ;;  %v3640_v21 = vld [vmem:[%s4593_s9 + $0x78] sm:$0xff]  }
 0x19f   : > { %v1389_v56 = vadd.f32 %v1388_v52, %v1387_v48  ;;  %v1403_v57 = vadd.f32 %v1402_v53, %v1401_v49  ;;  %v3614_v49 = vld [vmem:[%s4593_s9] sm:$0xff]   ;;  %v3616_v52 = vld [vmem:[%s4593_s9 + $0x48] sm:$0xff]  }
 0x1a0   : > { %v1396_v58 = vadd.f32 %v1395_v54, %v1394_v50  ;;  %v1410_v59 = vadd.f32 %v1409_v55, %v1408_v51  ;;  %v1634_v25 = vrot.slane %v1624_v22, %v1633_v23  ;;  %v1641_v26 = vrot.slane %v1627_v24, %v1633_v23  ;;  %v3615_v50 = vld [vmem:[%s4593_s9 + $0x80] sm:$0xff]   ;;  %v3617_v53 = vld [vmem:[%s4593_s9 + $0xc8] sm:$0xff]   ;;  %v3641_v22 = vld [vmem:[%s4593_s9 + $0xf8] sm:$0xff]  }
 0x1a1   : > { %v1390_v60 = vrot.slane %v1389_v56, 2  ;;  %v1404_v61 = vrot.slane %v1403_v57, 2  ;;  %v1821_v54 = vpack.c.bf16 %v4270_v46, %v4266_v44  ;;  %v1823_v55 = vpack.c.bf16 %v4272_v47, %v4268_v45  ;;  %v3642_v23 = vld [vmem:[%s4593_s9 + $0x38] sm:$0xff]  }
 0x1a2   : > { %v1397_v62 = vrot.slane %v1396_v58, 2  ;;  %v1411_v2 = vrot.slane %v1410_v59, 2  ;;  %v1642_v27 = vcombine.high %v1634_v25, %v1634_v25  ;;  %v1643_v28 = vcombine.high %v1641_v26, %v1641_v26  ;;  %v3643_v24 = vld [vmem:[%s4593_s9 + $0xb8] sm:$0xff]  }
 0x1a3   : > { %v1391_v6 = vadd.f32 %v1390_v60, %v1389_v56  ;;  %v1405_v7 = vadd.f32 %v1404_v61, %v1403_v57  ;;  %v3618_v56 = vld [vmem:[%s4593_s9 + $0x8] sm:$0xff]   ;;  %v3622_v60 = vld [vmem:[%s4593_s9 + $0x10] sm:$0xff]  }
 0x1a4   : > { %v1398_v8 = vadd.f32 %v1397_v62, %v1396_v58  ;;  %v1412_v9 = vadd.f32 %v1411_v2, %v1410_v59  ;;  %3112 = vmatprep.subr.msk.mxu0 %vm1669_vm6, %v1642_v27  ;;  %3115 = vmatprep.subr.msk.mxu1 %vm1669_vm6, %v1643_v28  ;;  %v3619_v57 = vld [vmem:[%s4593_s9 + $0x88] sm:$0xff]   ;;  %v3620_v58 = vld [vmem:[%s4593_s9 + $0x50] sm:$0xff]   ;;  %v3624_v62 = vld [vmem:[%s4593_s9 + $0x58] sm:$0xff]  }
 0x1a5   : > { %v1392_v10 = vrot.slane %v1391_v6, 1  ;;  %v1406_v11 = vrot.slane %v1405_v7, 1  ;;  %v3621_v59 = vld [vmem:[%s4593_s9 + $0xd0] sm:$0xff]   ;;  %v3625_v2 = vld [vmem:[%s4593_s9 + $0xd8] sm:$0xff]  }
 0x1a6   : > { %v1399_v12 = vrot.slane %v1398_v8, 1  ;;  %v1413_v13 = vrot.slane %v1412_v9, 1  ;;  %v3623_v61 = vld [vmem:[%s4593_s9 + $0x90] sm:$0xff]  }
 0x1a7   : > { %v1393_v17 = vadd.f32 %v1392_v10, %v1391_v6  ;;  %v1407_v18 = vadd.f32 %v1406_v11, %v1405_v7  ;;  %v3626_v6 = vld [vmem:[%s4593_s9 + $0x18] sm:$0xff]   ;;  %v3630_v10 = vld [vmem:[%s4593_s9 + $0x20] sm:$0xff]  }
 0x1a8   : > { %v1400_v14 = vadd.f32 %v1399_v12, %v1398_v8  ;;  %v1414_v15 = vadd.f32 %v1413_v13, %v1412_v9  ;;  %v3627_v7 = vld [vmem:[%s4593_s9 + $0x98] sm:$0xff]   ;;  %v3628_v8 = vld [vmem:[%s4593_s9 + $0x60] sm:$0xff]   ;;  %v3632_v12 = vld [vmem:[%s4593_s9 + $0x68] sm:$0xff]  }
 0x1a9   : > { %v3629_v9 = vld [vmem:[%s4593_s9 + $0xe0] sm:$0xff]   ;;  %v3633_v13 = vld [vmem:[%s4593_s9 + $0xe8] sm:$0xff]  }
 0x1aa   : > { %1543 = vmatprep.mubr.f32.mxu0 %v1400_v14  ;;  %1613 = vmatprep.mubr.f32.mxu1 %v1414_v15  ;;  %v3631_v11 = vld [vmem:[%s4593_s9 + $0xa0] sm:$0xff]   ;;  %v3634_v14 = vld [vmem:[%s4593_s9 + $0x28] sm:$0xff]  }
 0x1ab   : > { %1544 = vmatmul.mubr.f32.vlgmr.msra.gmra.mrb[4].mxu0 %v1393_v17  ;;  %1614 = vmatmul.mubr.f32.vlgmr.msra.gmra.mrb[4].mxu1 %v1407_v18  ;;  %v3635_v15 = vld [vmem:[%s4593_s9 + $0xa8] sm:$0xff]   ;;  %v3636_v17 = vld [vmem:[%s4593_s9 + $0x70] sm:$0xff]  }
 0x1ac   : > { %1742 = vmatprep.mubr.f32.mxu0 %v3714_v5  ;;  %1813 = vmatprep.mubr.f32.mxu1 %v3714_v5  ;;  %v3637_v18 = vld [vmem:[%s4593_s9 + $0xf0] sm:$0xff]  }
 0x1ad   : > { %3113 = vmatpush1.msk.msra.mxu0 %vm1669_vm6, %v1634_v25  ;;  %3116 = vmatpush1.msk.msra.mxu1 %vm1669_vm6, %v1641_v26  ;;  %v1820_v25 = vpack.c.bf16 %v4262_v42, %v4258_v40  ;;  %v1822_v26 = vpack.c.bf16 %v4264_v43, %v4260_v41 }
 0x1ae   : > { %3289 = vmatprep.subr.bf16.mxu0 %v3612_v29  ;;  %3311 = vmatprep.subr.bf16.mxu1 %v3613_v30 }
 0x27e   : > { %v3251_v63 = vpop.f32.mrb[4].mxu0  ;;  %v3286_v31 = vpop.f32.mrb[4].mxu1 }
 0x27f   : > { %v3252_v32 = vpop.f32.mrb[5].mxu0  ;;  %v3287_v33 = vpop.f32.mrb[5].mxu1 }
 0x280   : > { %v3253_v34 = vadd.f32 %v3252_v32, %v3251_v63  ;;  %v3288_v35 = vadd.f32 %v3287_v33, %v3286_v31  ;;  %v3644_v63 = vld [vmem:[%s4596_s12 + $0x18] sm:$0xff]  }
 0x282   : > { %v1616_v37 = vadd.f32 %v3288_v35, %v3253_v34 }
 0x284   : > { %v1620_v39 = vmul.f32 %v1619_v36, %v1616_v37 }
 0x286   : > { %v1622_v48 = vadd.f32 %v1621_v38, %v1620_v39 }
 0x288   : > { %v1623_v51 = vmax.f32 %v1622_v48, 0.0 }
 0x28a   : > { %3114 = vmatmul.mubr.msk.f32.vlgmr.msra.gmra.mrb[6].mxu0 %vm1665_vm7, %v1623_v51  ;;  %3117 = vmatmul.mubr.msk.f32.vlgmr.msra.gmra.mrb[6].mxu1 %vm1665_vm7, %v1623_v51 }
 0x28b   : > { %3290 = vmatpush3.bf16.msra.mxu0 %v3614_v49  ;;  %3312 = vmatpush3.bf16.msra.mxu1 %v3615_v50  ;;  %v3150_v49 = vld [vmem:[%s4594_s10] ss:$0 sm:$0xff] }
 0x28c   : > { %2112 = vmatprep.mubr.bf16.mxu0 %v1821_v54  ;;  %2153 = vmatprep.mubr.bf16.mxu1 %v1823_v55  ;;  %v3645_v50 = vld [vmem:[%s4596_s12 + $0x20] sm:$0xff]   ;;  %v3646_v55 = vld [vmem:[%s4596_s12 + $0x28] sm:$0xff]  }
 0x28d   : > { %3291 = vmatprep.subr.bf16.mxu0 %v3616_v52  ;;  %3313 = vmatprep.subr.bf16.mxu1 %v3617_v53  ;;  %v3151_v54 = vld [vmem:[%s4595_s11] ss:$0 sm:$0xff] }
 0x28f   : > { %3292 = vmatpush3.bf16.msra.mxu0 %v3618_v56  ;;  %3314 = vmatpush3.bf16.msra.mxu1 %v3619_v57 }
 0x290   : > { %3293 = vmatprep.subr.bf16.mxu0 %v3620_v58  ;;  %3315 = vmatprep.subr.bf16.mxu1 %v3621_v59 }
 0x293   : > { %3294 = vmatpush3.bf16.msra.mxu0 %v3622_v60  ;;  %3316 = vmatpush3.bf16.msra.mxu1 %v3623_v61 }
 0x294   : > { %3295 = vmatprep.subr.bf16.mxu0 %v3624_v62  ;;  %3317 = vmatprep.subr.bf16.mxu1 %v3625_v2 }
 0x297   : > { %3296 = vmatpush3.bf16.msra.mxu0 %v3626_v6  ;;  %3318 = vmatpush3.bf16.msra.mxu1 %v3627_v7 }
 0x298   : > { %3297 = vmatprep.subr.bf16.mxu0 %v3628_v8  ;;  %3319 = vmatprep.subr.bf16.mxu1 %v3629_v9  ;;  %v3647_v9 = vld [vmem:[%s4596_s12] sm:$0xff]  }
 0x29b   : > { %3298 = vmatpush3.bf16.msra.mxu0 %v3630_v10  ;;  %3320 = vmatpush3.bf16.msra.mxu1 %v3631_v11  ;;  %v3648_v11 = vld [vmem:[%s4596_s12 + $0x8] sm:$0xff]  }
 0x29c   : > { %3299 = vmatprep.subr.bf16.mxu0 %v3632_v12  ;;  %3321 = vmatprep.subr.bf16.mxu1 %v3633_v13  ;;  %v3649_v12 = vld [vmem:[%s4596_s12 + $0x10] sm:$0xff]  }
 0x29f   : > { %3300 = vmatpush3.bf16.msra.mxu0 %v3634_v14  ;;  %3322 = vmatpush3.bf16.msra.mxu1 %v3635_v15  ;;  %v3650_v15 = vld [vmem:[%s4596_s12 + $0x30] sm:$0xff]  }
 0x2a0   : > { %3301 = vmatprep.subr.bf16.mxu0 %v3636_v17  ;;  %3323 = vmatprep.subr.bf16.mxu1 %v3637_v18  ;;  %v3651_v18 = vld [vmem:[%s4596_s12 + $0x38] sm:$0xff]  }
 0x2a3   : > { %3302 = vmatpush3.bf16.msra.mxu0 %v3638_v19  ;;  %3324 = vmatpush3.bf16.msra.mxu1 %v3639_v20  ;;  %v3652_v19 = vld [vmem:[%s4596_s12 + $0x40] sm:$0xff]  }
 0x2a4   : > { %3303 = vmatprep.subr.bf16.mxu0 %v3640_v21  ;;  %3325 = vmatprep.subr.bf16.mxu1 %v3641_v22  ;;  %v3653_v22 = vld [vmem:[%s4599_s15 + $0x18] sm:$0xff]  }
 0x2a7   : > { %3304 = vmatpush3.bf16.msra.mxu0 %v3642_v23  ;;  %3326 = vmatpush3.bf16.msra.mxu1 %v3643_v24  ;;  %v3654_v23 = vld [vmem:[%s4599_s15 + $0x20] sm:$0xff]  }
 0x2a8   : > { %3357 = vmatprep.subr.bf16.mxu0 %v3714_v5  ;;  %3387 = vmatprep.subr.bf16.mxu1 %v3714_v5  ;;  %v3176_v24 = vld [vmem:[%s4597_s13] ss:$0 sm:$0xff] }
 0x2aa   : > { %2113 = vmatmul.mubr.bf16.vlgmr.msra.gmra.mrb[8].mxu0 %v1820_v25  ;;  %2154 = vmatmul.mubr.bf16.vlgmr.msra.gmra.mrb[8].mxu1 %v1822_v26  ;;  %v3655_v25 = vld [vmem:[%s4599_s15 + $0x28] sm:$0xff]  }
 0x2ab   : > { %3358 = vmatpush3.bf16.msra.mxu0 %v3644_v63  ;;  %3363 = vmatprep.mubr.msk.bf16.mxu0 %vm3718_vm11, %v3714_v5  ;;  %v3177_v63 = vld [vmem:[%s4598_s14] ss:$0 sm:$0xff] }
 0x2ac   : > { %3359 = vmatprep.subr.bf16.mxu0 %v3714_v5  ;;  %3393 = vmatprep.mubr.msk.bf16.mxu1 %vm3718_vm11, %v3714_v5 }
 0x2ad   : > { %3388 = vmatpush3.bf16.msra.mxu1 %v3653_v22 }
 0x2ae   : > { %3389 = vmatprep.subr.bf16.mxu1 %v3714_v5 }
 0x2af   : > { %3360 = vmatpush3.bf16.msra.mxu0 %v3645_v50 }
 0x2b0   : > { %3361 = vmatprep.subr.bf16.mxu0 %v3714_v5 }
 0x2b1   : > { %3390 = vmatpush3.bf16.msra.mxu1 %v3654_v23 }
 0x2b2   : > { %3391 = vmatprep.subr.bf16.mxu1 %v3714_v5 }
 0x2b3   : > { %3362 = vmatpush3.bf16.msra.mxu0 %v3646_v55  ;;  %v3658_v55 = vld [vmem:[%s4599_s15 + $0x10] sm:$0xff]  }
 0x2b4   : > { %3367 = vmatprep.subr.bf16.mxu0 %v3714_v5 }
 0x2b5   : > { %3392 = vmatpush3.bf16.msra.mxu1 %v3655_v25 }
 0x2b6   : > { %3397 = vmatprep.subr.bf16.mxu1 %v3714_v5 }
 0x35d   : > { %v4404_v27 = vpop.f32.mrb[6].mxu0  ;;  %v4406_v28 = vpop.f32.mrb[6].mxu1 }
 0x35e   : > { %v4408_v29 = vpop.f32.mrb[7].mxu0  ;;  %v4410_v30 = vpop.f32.mrb[7].mxu1 }
 0x37d   : > { %v3305_v31 = vpop.f32.mrb[8].mxu0  ;;  %v3327_v32 = vpop.f32.mrb[8].mxu1 }
 0x37e   : > { %v3306_v33 = vpop.f32.mrb[9].mxu0  ;;  %v3328_v34 = vpop.f32.mrb[9].mxu1 }
 0x37f   : > { %v3307_v35 = vadd.f32 %v3306_v33, %v3305_v31  ;;  %v3329_v36 = vadd.f32 %v3328_v34, %v3327_v32  ;;  %v3308_v37 = vpop.f32.mrb[10].mxu0  ;;  %v3330_v38 = vpop.f32.mrb[10].mxu1 }
 0x380   : > { %v3309_v39 = vpop.f32.mrb[11].mxu0  ;;  %v3331_v48 = vpop.f32.mrb[11].mxu1 }
 0x381   : > { %v2156_v51 = vadd.f32 %v3329_v36, %v3307_v35  ;;  %v3310_v52 = vadd.f32 %v3309_v39, %v3308_v37  ;;  %v3332_v53 = vadd.f32 %v3331_v48, %v3330_v38 }
 0x383   : > { %v2159_v56 = vadd.f32 %v3332_v53, %v3310_v52  ;;  %v2169_v57 = vmul.f32 %v3150_v49, %v2156_v51  ;;  %v3656_v52 = vld [vmem:[%s4599_s15] sm:$0xff]  }
 0x385   : > { %v2170_v58 = vmul.f32 %v3150_v49, %v2159_v56  ;;  %v2178_v59 = vadd.f32 %v3151_v54, %v2169_v57 }
 0x387   : > { %v2179_v60 = vadd.f32 %v3151_v54, %v2170_v58  ;;  %v2180_v61 = vmax.f32 %v2178_v59, 0.0  ;;  %v3657_v54 = vld [vmem:[%s4599_s15 + $0x8] sm:$0xff]   ;;  %v3659_v58 = vld [vmem:[%s4599_s15 + $0x30] sm:$0xff]  }
 0x389   : > { %2193 = vrot.lane.b32.xlu1 %v2180_v61, %s3719_s1  ;;  %v2181_v62 = vmax.f32 %v2179_v60, 0.0  ;;  %v3660_v60 = vld [vmem:[%s4599_s15 + $0x38] sm:$0xff]   ;;  %v3661_v61 = vld [vmem:[%s4599_s15 + $0x40] sm:$0xff]  }
 0x38d   : > { %2195 = vrot.lane.b32.xlu1 %v2181_v62, %s3719_s1 }
 0x3fb   : > { %v2194_v2 = vpop.permute.xlu1 %2193 }
 0x3fc   : > { %2200 = vst.msk [vmem:[#allocation3 + $0x4] sm:$0xff] %vm2199_vm12, %v2194_v2 }
 0x3ff   : > { %v2196_v6 = vpop.permute.xlu1 %2195 }
 0x400   : > { %2201 = vst.msk [vmem:[#allocation3 + $0xc] sm:$0xff] %vm2199_vm12, %v2196_v6  ;;  %v3664_v6 = vld [vmem:[%s4602_s18 + $0x4] ss:$16 sps:$4 sm:$0xff]  }
 0x403   : > { %v2211_v7 = vld [vmem:[#allocation3 + $0x4] sm:$0xff] }
 0x404   : > { %v2202_v14 = vld [vmem:[#allocation3] sm:$0xff] }
 0x407   : > { %v2212_v8 = vld [vmem:[#allocation3 + $0xc] sm:$0xff] }
 0x408   : > { %v2213_v10 = vpack.c.bf16 %v2212_v8, %v2211_v7  ;;  %v2203_v13 = vld [vmem:[#allocation3 + $0x8] sm:$0xff]  ;;  %v2347_v20 = vld [vmem:[#allocation3 + $0x10] sm:$0xff] }
 0x409   : > { %v2204_v17 = vpack.c.bf16 %v2203_v13, %v2202_v14  ;;  %v2348_v21 = vpack.c.bf16 %v2347_v20, %v2203_v13  ;;  %v3667_v7 = vld [vmem:[%s4602_s18 + $0xc] ss:$16 sps:$4 sm:$0xff]   ;;  %v3662_v8 = vld [vmem:[%s4602_s18] ss:$16 sps:$4 sm:$0xff]  }
 0x40a   : > { %3364 = vmatmul.mubr.msk.bf16.vlgmr.msra.gmra.mrb[12].mxu0 %vm2239_vm13, %v2213_v10  ;;  %v3668_v10 = vld [vmem:[%s4602_s18 + $0x20] ss:$16 sps:$4 sm:$0xff]  }
 0x40b   : > { %3368 = vmatpush3.bf16.msra.mxu0 %v3647_v9  ;;  %3373 = vmatprep.mubr.msk.bf16.mxu0 %vm3718_vm11, %v3714_v5  ;;  %v3673_v9 = vld [vmem:[%s4602_s18 + $0x2c] ss:$16 sps:$4 sm:$0xff]   ;;  %v3202_v13 = vld [vmem:[%s4600_s16] ss:$0 sm:$0xff] }
 0x40c   : > { %3369 = vmatprep.subr.bf16.mxu0 %v3714_v5 }
 0x40f   : > { %3370 = vmatpush3.bf16.msra.mxu0 %v3648_v11  ;;  %v3671_v11 = vld [vmem:[%s4602_s18 + $0x28] ss:$16 sps:$4 sm:$0xff]  }
 0x410   : > { %3371 = vmatprep.subr.bf16.mxu0 %v3714_v5 }
 0x413   : > { %3372 = vmatpush3.bf16.msra.mxu0 %v3649_v12  ;;  %v3204_v12 = vld [vmem:[#allocation5] ss:$0 sm:$0xff] }
 0x414   : > { %3377 = vmatprep.subr.bf16.mxu0 %v3714_v5 }
 0x416   : > { %3374 = vmatmul.mubr.msk.bf16.vlgmr.msra.gmra.mrb[12].mxu0 %vm2239_vm13, %v2204_v17 }
 0x417   : > { %3378 = vmatpush3.bf16.msra.mxu0 %v3650_v15  ;;  %3383 = vmatprep.mubr.msk.bf16.mxu0 %vm3718_vm11, %v3714_v5  ;;  %v3203_v15 = vld [vmem:[%s4601_s17] ss:$0 sm:$0xff] }
 0x418   : > { %3379 = vmatprep.subr.bf16.mxu0 %v3714_v5 }
 0x41b   : > { %3380 = vmatpush3.bf16.msra.mxu0 %v3651_v18 }
 0x41c   : > { %3381 = vmatprep.subr.bf16.mxu0 %v3714_v5 }
 0x41f   : > { %3382 = vmatpush3.bf16.msra.mxu0 %v3652_v19 }
 0x420   : > { %2750 = vmatprep.subr.bf16.mxu0 %v3664_v6 }
 0x422   : > { %3384 = vmatmul.mubr.msk.bf16.vlgmr.msra.gmra.mrb[12].mxu0 %vm2239_vm13, %v2348_v21 }
 0x423   : > { %2782 = vmatprep.mubr.bf16.mxu0 %v3716_v16  ;;  %2751 = vmatpush1.bf16.msra.mxu0 %v3662_v8 }
 0x4f5   : > { %v2411_v26 = vpop.f32.mrb[12].mxu0 }
 0x4f6   : > { %v2427_v31 = vmul.f32 %v3176_v24, %v2411_v26  ;;  %v3385_v32 = vpop.f32.mrb[13].mxu0 }
 0x4f7   : > { %v2414_v33 = vpop.f32.mrb[14].mxu0 }
 0x4f8   : > { %v2436_v34 = vadd.f32 %v3177_v63, %v2427_v31  ;;  %v2428_v35 = vmul.f32 %v3176_v24, %v2414_v33  ;;  %v3386_v36 = vpop.f32.mrb[15].mxu0 }
 0x4fa   : > { %v2438_v37 = vmax.f32 %v2436_v34, 0.0  ;;  %v2437_v38 = vadd.f32 %v3177_v63, %v2428_v35  ;;  %v1625_v63 = vld [vmem:[%s4592_s8] sm:$0xf] }
 0x4fb   : > { %v1648_v31 = vrot.slane %v1625_v63, %v4233_v0  ;;  %v1656_v32 = vrot.slane %v1625_v63, %v4236_v1  ;;  %v1652_v33 = vrot.slane %v1625_v63, %v4242_v3  ;;  %v1660_v34 = vrot.slane %v1625_v63, %v4245_v4 }
 0x4fc   : > { %v2439_v39 = vmax.f32 %v2437_v38, 0.0  ;;  %2442 = vrot.lane.b32.xlu0 %v2438_v37, %s3719_s1 }
 0x4fd   : > { %v1745_v35 = vadd.f32 %v4404_v27, %v1648_v31  ;;  %v1816_v36 = vadd.f32 %v4406_v28, %v1656_v32  ;;  %v1747_v37 = vadd.f32 %v4408_v29, %v1652_v33  ;;  %v1818_v38 = vadd.f32 %v4410_v30, %v1660_v34 }
 0x4fe   : > { %2444 = vrot.lane.b32.xlu1 %v2439_v39, %s3719_s1 }
 0x4ff   : > { %v2843_v4 = vrot.slane %v1747_v37, %v4233_v0  ;;  %v2851_v27 = vrot.slane %v1818_v38, %v4233_v0 }
 0x500   : > { %2703 = vperm.xlu0 %3527, %v3204_v12  }
 0x56e   : > { %v2443_v48 = vpop.permute.xlu0 %2442 }
 0x56f   : > { %2448 = vst.msk [vmem:[#allocation3 + $0x4] sm:$0xff] %vm2199_vm12, %v2443_v48 }
 0x570   : > { %v2445_v49 = vpop.permute.xlu1 %2444 }
 0x571   : > { %2449 = vst.msk [vmem:[#allocation3 + $0xc] sm:$0xff] %vm2199_vm12, %v2445_v49 }
 0x576   : > { %v2459_v50 = vld [vmem:[#allocation3 + $0x4] sm:$0xff] }
 0x577   : > { %v2450_v57 = vld [vmem:[#allocation3] sm:$0xff] }
 0x578   : > { %v2460_v51 = vld [vmem:[#allocation3 + $0xc] sm:$0xff] }
 0x579   : > { %v2461_v53 = vpack.c.bf16 %v2460_v51, %v2459_v50  ;;  %v2451_v56 = vld [vmem:[#allocation3 + $0x8] sm:$0xff]  ;;  %v2594_v62 = vld [vmem:[#allocation3 + $0x10] sm:$0xff]  ;;  %v2839_v50 = vrot.slane %v1745_v35, %v4233_v0  ;;  %v2847_v51 = vrot.slane %v1816_v36, %v4233_v0 }
 0x57a   : > { %v2452_v59 = vpack.c.bf16 %v2451_v56, %v2450_v57  ;;  %v2595_v2 = vpack.c.bf16 %v2594_v62, %v2451_v56 }
 0x57b   : > { %3394 = vmatmul.mubr.msk.bf16.vlgmr.msra.gmra.mrb[12].mxu1 %vm2239_vm13, %v2461_v53 }
 0x57c   : > { %3398 = vmatpush3.bf16.msra.mxu1 %v3656_v52  ;;  %3403 = vmatprep.mubr.msk.bf16.mxu1 %vm3718_vm11, %v3714_v5 }
 0x57d   : > { %3399 = vmatprep.subr.bf16.mxu1 %v3714_v5 }
 0x57f   : > { %v2704_v39 = vpop.permute.xlu0 %2703 }
 0x580   : > { %3400 = vmatpush3.bf16.msra.mxu1 %v3657_v54 }
 0x581   : > { %3401 = vmatprep.subr.bf16.mxu1 %v3714_v5 }
 0x584   : > { %3402 = vmatpush3.bf16.msra.mxu1 %v3658_v55 }
 0x585   : > { %3407 = vmatprep.subr.bf16.mxu1 %v3714_v5 }
 0x587   : > { %3404 = vmatmul.mubr.msk.bf16.vlgmr.msra.gmra.mrb[12].mxu1 %vm2239_vm13, %v2452_v59 }
 0x588   : > { %3408 = vmatpush3.bf16.msra.mxu1 %v3659_v58  ;;  %3413 = vmatprep.mubr.msk.bf16.mxu1 %vm3718_vm11, %v3714_v5 }
 0x589   : > { %3409 = vmatprep.subr.bf16.mxu1 %v3714_v5 }
 0x58c   : > { %3410 = vmatpush3.bf16.msra.mxu1 %v3660_v60 }
 0x58d   : > { %3411 = vmatprep.subr.bf16.mxu1 %v3714_v5  ;;  %v3665_v5 = vld [vmem:[%s4602_s18 + $0x8] ss:$16 sps:$4 sm:$0xff]  }
 0x590   : > { %3412 = vmatpush3.bf16.msra.mxu1 %v3661_v61 }
 0x591   : > { %2793 = vmatprep.subr.bf16.mxu1 %v3667_v7 }
 0x593   : > { %3414 = vmatmul.mubr.msk.bf16.vlgmr.msra.gmra.mrb[12].mxu1 %vm2239_vm13, %v2595_v2 }
 0x594   : > { %2825 = vmatprep.mubr.bf16.mxu1 %v3716_v16  ;;  %2794 = vmatpush1.bf16.msra.mxu1 %v3665_v5  ;;  %v3670_v16 = vld [vmem:[%s4602_s18 + $0x24] ss:$16 sps:$4 sm:$0xff]  }
 0x595   : > { %2752 = vmatprep.subr.bf16.mxu0 %v3670_v16  ;;  %2795 = vmatprep.subr.bf16.mxu1 %v3673_v9 }
 0x596   : > { %2753 = vmatpush1.bf16.msra.mxu0 %v3668_v10 }
 0x598   : > { %2796 = vmatpush1.bf16.msra.mxu1 %v3671_v11 }
 0x666   : > { %v2658_v14 = vpop.f32.mrb[12].mxu1 }
 0x667   : > { %v2674_v17 = vmul.f32 %v3202_v13, %v2658_v14  ;;  %v3415_v18 = vpop.f32.mrb[13].mxu1 }
 0x668   : > { %v2661_v19 = vpop.f32.mrb[14].mxu1 }
 0x669   : > { %v2683_v20 = vadd.f32 %v3203_v15, %v2674_v17  ;;  %v2675_v21 = vmul.f32 %v3202_v13, %v2661_v19  ;;  %v3416_v22 = vpop.f32.mrb[15].mxu1 }
 0x66b   : > { %v2684_v23 = vadd.f32 %v3203_v15, %v2675_v21  ;;  %v2685_v24 = vmax.f32 %v2683_v20, 0.0 }
 0x66d   : > { %v2686_v25 = vmax.f32 %v2684_v23, 0.0 }
 0x66f   : > { %v2687_v26 = vpack.c.bf16 %v2686_v25, %v2685_v24 }
 0x671   : > { %3213 = vmatmul.mubr.msk.bf16.vlgmr.msra.gmra.mrb[16].mxu0 %vm2746_vm14, %v2687_v26  ;;  %3214 = vmatmul.mubr.msk.bf16.vlgmr.msra.gmra.mrb[16].mxu1 %vm2746_vm14, %v2687_v26 }
 0x744   : > { %v2784_v48 = vpop.f32.mrb[16].mxu0  ;;  %v2827_v49 = vpop.f32.mrb[16].mxu1 }
 0x745   : > { %v2785_v1 = vadd.f32 %v2784_v48, %v2704_v39  ;;  %v2828_v52 = vadd.f32 %v2827_v49, %v2704_v39  ;;  %v2786_v3 = vpop.f32.mrb[17].mxu0  ;;  %v2829_v53 = vpop.f32.mrb[17].mxu1 }
 0x746   : > { %v2787_v28 = vadd.f32 %v2786_v3, %v2704_v39  ;;  %v2830_v54 = vadd.f32 %v2829_v53, %v2704_v39  ;;  %v2788_v29 = vpop.f32.mrb[18].mxu0  ;;  %v2831_v55 = vpop.f32.mrb[18].mxu1 }
 0x747   : > { %v2852_v30 = vmul.f32 %v2839_v50, %v2785_v1  ;;  %v2854_v56 = vmul.f32 %v2847_v51, %v2828_v52  ;;  %v2789_v57 = vadd.f32 %v2788_v29, %v2704_v39  ;;  %v2832_v58 = vadd.f32 %v2831_v55, %v2704_v39  ;;  %v2790_v59 = vpop.f32.mrb[19].mxu0  ;;  %v2833_v60 = vpop.f32.mrb[19].mxu1 }
 0x748   : > { %v2853_v61 = vmul.f32 %v2843_v4, %v2787_v28  ;;  %v2855_v62 = vmul.f32 %v2851_v27, %v2830_v54  ;;  %v2791_v2 = vadd.f32 %v2790_v59, %v2704_v39  ;;  %v2834_v6 = vadd.f32 %v2833_v60, %v2704_v39 }
 0x749   : > { %v2860_v7 = vsub.f32 0.0, %v2852_v30  ;;  %v2862_v8 = vsub.f32 0.0, %v2854_v56  ;;  %v2856_v5 = vmul.f32 %v2839_v50, %v2789_v57  ;;  %v2858_v16 = vmul.f32 %v2847_v51, %v2832_v58 }
 0x74a   : > { %v2861_v9 = vsub.f32 0.0, %v2853_v61  ;;  %v2863_v0 = vsub.f32 0.0, %v2855_v62  ;;  %v2857_v10 = vmul.f32 %v2843_v4, %v2791_v2  ;;  %v2859_v11 = vmul.f32 %v2851_v27, %v2834_v6 }
 0x74b   : > { %v2868_v12 = vmul.f32 1.442695, %v2860_v7  ;;  %v2872_v13 = vmul.f32 1.442695, %v2862_v8  ;;  %v2864_v14 = vsub.f32 0.0, %v2856_v5  ;;  %v2866_v15 = vsub.f32 0.0, %v2858_v16 }
 0x74c   : > { %v2870_v17 = vmul.f32 1.442695, %v2861_v9  ;;  %v2874_v18 = vmul.f32 1.442695, %v2863_v0  ;;  %v2865_v19 = vsub.f32 0.0, %v2857_v10  ;;  %v2867_v20 = vsub.f32 0.0, %v2859_v11 }
 0x74d   : > { %3674 = vpow2.f32 %v2868_v12  ;;  %v2876_v21 = vmul.f32 1.442695, %v2864_v14  ;;  %v2880_v22 = vmul.f32 1.442695, %v2866_v15 }
 0x74e   : > { %3676 = vpow2.f32 %v2872_v13  ;;  %v2878_v23 = vmul.f32 1.442695, %v2865_v19  ;;  %v2882_v24 = vmul.f32 1.442695, %v2867_v20 }
 0x74f   : > { %3678 = vpow2.f32 %v2870_v17 }
 0x750   : > { %3680 = vpow2.f32 %v2874_v18 }
 0x751   : > { %3682 = vpow2.f32 %v2876_v21 }
 0x752   : > { %3684 = vpow2.f32 %v2880_v22 }
 0x753   : > { %3686 = vpow2.f32 %v2878_v23 }
 0x754   : > { %3688 = vpow2.f32 %v2882_v24 }
 0x757   : > { %v3675_v25 = vpop.eup %3674 }
 0x758   : > { %v3677_v26 = vpop.eup %3676  ;;  %v2884_v63 = vadd.f32 1.0, %v3675_v25 }
 0x759   : > { %v3679_v31 = vpop.eup %3678  ;;  %v2886_v32 = vadd.f32 1.0, %v3677_v26 }
 0x75a   : > { %v3681_v33 = vpop.eup %3680  ;;  %3690 = vrcp.f32 %v2884_v63  ;;  %v2885_v34 = vadd.f32 1.0, %v3679_v31 }
 0x75b   : > { %v3683_v35 = vpop.eup %3682  ;;  %3692 = vrcp.f32 %v2886_v32  ;;  %v2887_v36 = vadd.f32 1.0, %v3681_v33 }
 0x75c   : > { %v3685_v37 = vpop.eup %3684  ;;  %3694 = vrcp.f32 %v2885_v34  ;;  %v2888_v38 = vadd.f32 1.0, %v3683_v35 }
 0x75d   : > { %v3687_v39 = vpop.eup %3686  ;;  %3696 = vrcp.f32 %v2887_v36  ;;  %v2890_v48 = vadd.f32 1.0, %v3685_v37 }
 0x75e   : > { %v3689_v49 = vpop.eup %3688  ;;  %3698 = vrcp.f32 %v2888_v38  ;;  %v2889_v50 = vadd.f32 1.0, %v3687_v39 }
 0x75f   : > { %3700 = vrcp.f32 %v2890_v48  ;;  %v2891_v51 = vadd.f32 1.0, %v3689_v49 }
 0x760   : > { %3702 = vrcp.f32 %v2889_v50 }
 0x761   : > { %3704 = vrcp.f32 %v2891_v51 }
 0x764   : > { %v3691_v1 = vpop.eup %3690 }
 0x765   : > { %v3693_v52 = vpop.eup %3692  ;;  %v2908_v3 = vadd.f32 1.0, %v3691_v1 }
 0x766   : > { %v3695_v53 = vpop.eup %3694  ;;  %v2910_v4 = vadd.f32 1.0, %v3693_v52 }
 0x767   : > { %v3697_v27 = vpop.eup %3696  ;;  %v2924_v28 = vmul.f32 %v2908_v3, %v4258_v40  ;;  %v2909_v54 = vadd.f32 1.0, %v3695_v53 }
 0x768   : > { %v3699_v29 = vpop.eup %3698  ;;  %v2926_v55 = vmul.f32 %v2910_v4, %v4260_v41  ;;  %v2911_v30 = vadd.f32 1.0, %v3697_v27 }
 0x769   : > { %v3701_v56 = vpop.eup %3700  ;;  %2932 = vst [vmem:[%s631_s2] sm:$0xff] %v2924_v28  ;;  %v2925_v57 = vmul.f32 %v2909_v54, %v4266_v44  ;;  %v2912_v58 = vadd.f32 1.0, %v3699_v29 }
 0x76a   : > { %v3703_v59 = vpop.eup %3702  ;;  %2934 = vst [vmem:[%s631_s2 + $0x10] sm:$0xff] %v2926_v55  ;;  %v2927_v60 = vmul.f32 %v2911_v30, %v4268_v45  ;;  %v2914_v61 = vadd.f32 1.0, %v3701_v56 }
 0x76b   : > { %v3705_v62 = vpop.eup %3704  ;;  %2933 = vst [vmem:[%s631_s2 + $0x8] sm:$0xff] %v2925_v57  ;;  %v2928_v2 = vmul.f32 %v2912_v58, %v4262_v42  ;;  %v2913_v40 = vadd.f32 1.0, %v3703_v59 }
 0x76c   : > { %2935 = vst [vmem:[%s631_s2 + $0x18] sm:$0xff] %v2927_v60  ;;  %v2930_v6 = vmul.f32 %v2914_v61, %v4264_v43  ;;  %v2915_v41 = vadd.f32 1.0, %v3705_v62 }
 0x76d   : > { %2936 = vst [vmem:[%s631_s2 + $0x20] sm:$0xff] %v2928_v2  ;;  %v2929_v7 = vmul.f32 %v2913_v40, %v4270_v46 }
 0x76e   : > { %2938 = vst [vmem:[%s631_s2 + $0x30] sm:$0xff] %v2930_v6  ;;  %v2931_v44 = vmul.f32 %v2915_v41, %v4272_v47 }
 0x76f   : > { %2937 = vst [vmem:[%s631_s2 + $0x28] sm:$0xff] %v2929_v7 }
 0x770   : > { %2939 = vst [vmem:[%s631_s2 + $0x38] sm:$0xff] %v2931_v44 }
 0x771 PF: > { %s32_s23 = sadd.s32 1, %s3712_s23  }
 0x772   : > { %p29_p4 = scmp.ge.s32.totalorder %s32_s23, 4  }
 0x774   :  { %31 = sbr.rel (!%p29_p4) target bundleno = 6 (0x6), region = 136 }

</bundles_post_ra>
